<compile_context>
chip_gen: v5e
topology: v5e:2x2
jax: 0.10.0
libtpu: 0.0.40
codegen_flags: <defaults>
</compile_context>

<pallas_src>
import functools
import math

import jax
import jax.numpy as jnp
from jax.experimental import pallas as pl
from jax.experimental.pallas import tpu as pltpu

LN_EPS = 1e-5  # PyTorch nn.LayerNorm default

# rows of the packed "vector params" slab (per layer)
_ROW_BQKV, _ROW_FCB, _ROW_LN1G, _ROW_LN1B, _ROW_B1, _ROW_B2, _ROW_LN2G, _ROW_LN2B = range(8)


def _nbytes(a):
    return int(a.size) * a.dtype.itemsize


# ----------------------------------------------------------------------------
# Pallas kernel: the FULL encoder stack for one batch tile.
# ----------------------------------------------------------------------------
def encoder_stack_kernel(
    x_ref,        # (bt, L, D)                     f32
    wqkv_ref,     # (n_layers, D, 2*H*dk + H*dv)   bf16   (1/sqrt(dk) folded into Wq,bq)
    fcw_ref,      # (n_layers, H*dv, D)            bf16
    w1_ref,       # (n_layers, D, d_inner)         bf16
    w2_ref,       # (n_layers, d_inner, D)         bf16
    vec_ref,      # (n_layers, 8, VPAD)            f32    (biases + LN params)
    mask_ref,     # (bt*L, bt*L)                   f32    0 on same-example blocks, -1e30 off
    ident_ref,    # (L, L)                         f32    exact identity (inter-layer transpose)
    out_ref,      # (bt, L, D)                     f32    (pre-final-transpose layout)
    *, n_layers, n_head, d_k, d_v,
):
    bt, L, D = x_ref.shape
    d_inner = w1_ref.shape[-1]
    hdk = n_head * d_k
    hdv = n_head * d_v
    R = bt * L

    mask_add = mask_ref[...]   # keeps examples independent inside the fused score block
    ident = ident_ref[...]

    # Flatten batch into sublanes: all projections / LN / FFN become one big-M op.
    x = x_ref[...].reshape(R, D)

    for l in range(n_layers):  # static unroll over layers (n_layers is small)
        wqkv = wqkv_ref[l]     # (D, 2*hdk+hdv) bf16
        fcw = fcw_ref[l]       # (hdv, D)       bf16
        w1 = w1_ref[l]         # (D, d_inner)   bf16
        w2 = w2_ref[l]         # (d_inner, D)   bf16
        vec = vec_ref[l]       # (8, VPAD)      f32

        bqkv = vec[_ROW_BQKV:_ROW_BQKV + 1, :2 * hdk + hdv]
        fcb = vec[_ROW_FCB:_ROW_FCB + 1, :D]
        ln1g = vec[_ROW_LN1G:_ROW_LN1G + 1, :D]
        ln1b = vec[_ROW_LN1B:_ROW_LN1B + 1, :D]
        b1 = vec[_ROW_B1:_ROW_B1 + 1, :d_inner]
        b2 = vec[_ROW_B2:_ROW_B2 + 1, :D]
        ln2g = vec[_ROW_LN2G:_ROW_LN2G + 1, :D]
        ln2b = vec[_ROW_LN2B:_ROW_LN2B + 1, :D]

        # --- multi-head self-attention (fused QKV projection, whole batch) --
        xb = x.astype(jnp.bfloat16)
        qkv = jnp.dot(xb, wqkv, preferred_element_type=jnp.float32) + bqkv
        q = qkv[:, :hdk].astype(jnp.bfloat16)            # q-scale pre-folded
        k = qkv[:, hdk:2 * hdk].astype(jnp.bfloat16)
        v = qkv[:, 2 * hdk:2 * hdk + hdv].astype(jnp.bfloat16)

        heads = []
        for h in range(n_head):                           # static unroll
            qh = q[:, h * d_k:(h + 1) * d_k]
            kh = k[:, h * d_k:(h + 1) * d_k]
            vh = v[:, h * d_v:(h + 1) * d_v]
            # scores for ALL examples of the tile at once (block-diag masked)
            s = jax.lax.dot_general(qh, kh, (((1,), (1,)), ((), ())),
                                    preferred_element_type=jnp.float32)
            s = s + mask_add
            s = s - jnp.max(s, axis=-1, keepdims=True)
            e = jnp.exp(s)                                # f32 softmax, exact divide
            a = e / jnp.sum(e, axis=-1, keepdims=True)
            heads.append(jnp.dot(a.astype(jnp.bfloat16), vh,
                                 preferred_element_type=jnp.float32))  # (R, dv)

        # concat heads along lanes -> ONE fused output projection matmul
        oh_all = jnp.concatenate(heads, axis=1).astype(jnp.bfloat16)   # (R, hdv)
        attn = jnp.dot(oh_all, fcw, preferred_element_type=jnp.float32)

        o = attn + fcb + x                                # fc bias + residual
        mu = jnp.mean(o, axis=-1, keepdims=True)
        var = jnp.mean((o - mu) ** 2, axis=-1, keepdims=True)
        o = (o - mu) * jax.lax.rsqrt(var + LN_EPS) * ln1g + ln1b

        # --- position-wise FFN (Conv1d k=1 == per-position Linear) ----------
        hid = jnp.dot(o.astype(jnp.bfloat16), w1,
                      preferred_element_type=jnp.float32) + b1
        hid = jnp.maximum(hid, 0.0)                       # ReLU
        f = jnp.dot(hid.astype(jnp.bfloat16), w2,
                    preferred_element_type=jnp.float32) + b2 + o
        mu2 = jnp.mean(f, axis=-1, keepdims=True)
        var2 = jnp.mean((f - mu2) ** 2, axis=-1, keepdims=True)
        f = (f - mu2) * jax.lax.rsqrt(var2 + LN_EPS) * ln2g + ln2b

        if l + 1 < n_layers:
            # torch.transpose(enc_output, 1, 2) feeding the next layer:
            # per-example exact-identity contraction (x_next[b] = f[b].T).
            parts = []
            for b in range(bt):
                fb = f[b * L:(b + 1) * L, :]
                parts.append(jax.lax.dot_general(
                    ident, fb, (((1,), (1,)), ((), ())),
                    preferred_element_type=jnp.float32))
            x = jnp.concatenate(parts, axis=0)
        else:
            # last layer: the final transpose is pure layout, done in the wrapper
            x = f

    out_ref[...] = x.reshape(bt, L, D)


# ----------------------------------------------------------------------------
# Host-side parameter packing
# ----------------------------------------------------------------------------
def pack_encoder_params(layer_params, *, n_head, d_k, d_v):
    d_model = layer_params[0]["wq"].shape[0]
    d_inner = layer_params[0]["w1"].shape[1]
    hdk, hdv = n_head * d_k, n_head * d_v
    qkvw = 2 * hdk + hdv
    scale = 1.0 / math.sqrt(d_k)
    widths = [qkvw, d_model, d_model, d_model, d_inner, d_model, d_model, d_model]
    vpad = ((max(widths) + 127) // 128) * 128   # lane-pad the bias/LN slab

    wqkv_l, fcw_l, w1_l, w2_l, vec_l = [], [], [], [], []
    for p in layer_params:
        # fold 1/sqrt(d_k) into the q projection (weight AND bias)
        wqkv = jnp.concatenate([p["wq"] * scale, p["wk"], p["wv"]], axis=1)
        wqkv_l.append(wqkv.astype(jnp.bfloat16))
        fcw_l.append(p["fcw"].astype(jnp.bfloat16))            # (hdv, d_model)
        w1_l.append(p["w1"].astype(jnp.bfloat16))
        w2_l.append(p["w2"].astype(jnp.bfloat16))
        rows = [
            jnp.concatenate([p["bq"] * scale, p["bk"], p["bv"]], axis=1),
            p["fcb"], p["ln1g"], p["ln1b"], p["b1"], p["b2"], p["ln2g"], p["ln2b"],
        ]
        padded = [jnp.pad(r, ((0, 0), (0, vpad - r.shape[1]))) for r in rows]
        vec_l.append(jnp.concatenate(padded, axis=0).astype(jnp.float32))

    return (jnp.stack(wqkv_l), jnp.stack(fcw_l), jnp.stack(w1_l),
            jnp.stack(w2_l), jnp.stack(vec_l))


def encoder_forward_pallas(x, layer_params, *, n_head, d_k, d_v, batch_tile=None):
    B, L, D = x.shape
    n_layers = len(layer_params)
    if n_layers > 1:
        # per-layer transpose(1, 2) feeding the next layer requires window == d_model
        assert L == D, "Encoder with n_layers>1 transpose(1,2) requires window == d_model"

    # Whole batch in one grid step by default (biggest win at small B);
    # for v7x one would pick batch_tile = B // 2 so both TensorCores get work.
    bt = B if batch_tile is None else batch_tile
    assert B % bt == 0, "batch_tile must divide batch"

    wqkv_all, fcw_all, w1_all, w2_all, vec_all = pack_encoder_params(
        layer_params, n_head=n_head, d_k=d_k, d_v=d_v)

    d_inner = w1_all.shape[-1]
    hdk, hdv = n_head * d_k, n_head * d_v
    R = bt * L

    # block-diagonal additive mask (0 within an example, -1e30 across examples)
    ex = jnp.arange(R, dtype=jnp.int32) // L
    attn_mask = jnp.where(ex[:, None] == ex[None, :], 0.0, -1e30).astype(jnp.float32)
    ident = jnp.eye(L, dtype=jnp.float32)

    kernel = functools.partial(
        encoder_stack_kernel,
        n_layers=n_layers, n_head=n_head, d_k=d_k, d_v=d_v)

    weight_bytes = sum(_nbytes(a) for a in (wqkv_all, fcw_all, w1_all, w2_all, vec_all))
    small_bytes = _nbytes(attn_mask) + _nbytes(ident)
    act_bytes = 2 * bt * L * D * 4                      # input + output block (f32)
    vmem_limit = int(min(64 << 20,
                         max(16 << 20,
                             2 * (weight_bytes + small_bytes + act_bytes) + (4 << 20))))

    qkvw = 2 * hdk + hdv
    flops = n_layers * 2 * B * L * (D * qkvw + L * hdk + L * hdv
                                    + hdv * D + 2 * D * d_inner)
    transcendentals = n_layers * n_head * B * L * L
    bytes_accessed = 2 * B * L * D * 4 + weight_bytes + small_bytes

    out_ld = pl.pallas_call(
        kernel,
        out_shape=jax.ShapeDtypeStruct((B, L, D), jnp.float32),
        grid=(B // bt,),
        in_specs=[
            pl.BlockSpec((bt, L, D), lambda nb: (nb, 0, 0)),        # activations
            pl.BlockSpec(wqkv_all.shape, lambda nb: (0, 0, 0)),     # VMEM-resident
            pl.BlockSpec(fcw_all.shape, lambda nb: (0, 0, 0)),      # weights
            pl.BlockSpec(w1_all.shape, lambda nb: (0, 0, 0)),
            pl.BlockSpec(w2_all.shape, lambda nb: (0, 0, 0)),
            pl.BlockSpec(vec_all.shape, lambda nb: (0, 0, 0)),
            pl.BlockSpec(attn_mask.shape, lambda nb: (0, 0)),
            pl.BlockSpec(ident.shape, lambda nb: (0, 0)),
        ],
        out_specs=pl.BlockSpec((bt, L, D), lambda nb: (nb, 0, 0)),
        compiler_params=pltpu.CompilerParams(
            dimension_semantics=("parallel",),
            vmem_limit_bytes=vmem_limit),
        cost_estimate=pl.CostEstimate(flops=int(flops),
                                      transcendentals=int(transcendentals),
                                      bytes_accessed=int(bytes_accessed)),
    )(x, wqkv_all, fcw_all, w1_all, w2_all, vec_all, attn_mask, ident)

    # torch.transpose(enc_output, 1, 2) after the LAST layer is pure layout
    # plumbing — done here by XLA instead of an extra in-kernel MXU op.
    return jnp.transpose(out_ld, (0, 2, 1))


# ----------------------------------------------------------------------------
# Pure-JAX reference (mirrors the kernel's bf16-matmul / f32-elementwise math)
# ----------------------------------------------------------------------------
def _layernorm_ref(x, g, b):
    mu = jnp.mean(x, axis=-1, keepdims=True)
    var = jnp.mean((x - mu) ** 2, axis=-1, keepdims=True)
    return (x - mu) * jax.lax.rsqrt(var + LN_EPS) * g + b


def _layer_ref(x, p, n_head, d_k, d_v):
    bf = jnp.bfloat16
    f32 = jnp.float32
    scale = 1.0 / math.sqrt(d_k)
    d_model = p["wq"].shape[0]
    xb = x.astype(bf)
    q = jnp.dot(xb, (p["wq"] * scale).astype(bf), preferred_element_type=f32) + p["bq"] * scale
    k = jnp.dot(xb, p["wk"].astype(bf), preferred_element_type=f32) + p["bk"]
    v = jnp.dot(xb, p["wv"].astype(bf), preferred_element_type=f32) + p["bv"]
    fcw3 = p["fcw"].reshape(n_head, d_v, d_model).astype(bf)
    attn = jnp.zeros(x.shape[:-1] + (d_model,), f32)
    for h in range(n_head):
        qh = q[..., h * d_k:(h + 1) * d_k].astype(bf)
        kh = k[..., h * d_k:(h + 1) * d_k].astype(bf)
        vh = v[..., h * d_v:(h + 1) * d_v].astype(bf)
        s = jnp.einsum("bqd,bkd->bqk", qh, kh, preferred_element_type=f32)
        s = s - jnp.max(s, axis=-1, keepdims=True)
        e = jnp.exp(s)
        a = e / jnp.sum(e, axis=-1, keepdims=True)
        oh = jnp.einsum("bqk,bkd->bqd", a.astype(bf), vh, preferred_element_type=f32)
        attn = attn + jnp.einsum("bqd,dm->bqm", oh.astype(bf), fcw3[h],
                                 preferred_element_type=f32)
    o = _layernorm_ref(attn + p["fcb"] + x, p["ln1g"], p["ln1b"])
    hid = jnp.dot(o.astype(bf), p["w1"].astype(bf), preferred_element_type=f32) + p["b1"]
    hid = jnp.maximum(hid, 0.0)
    f = jnp.dot(hid.astype(bf), p["w2"].astype(bf), preferred_element_type=f32) + p["b2"] + o
    return _layernorm_ref(f, p["ln2g"], p["ln2b"])


def encoder_forward_ref(x, layer_params, *, n_head, d_k, d_v):
    out = x
    for p in layer_params:
        out = _layer_ref(out, p, n_head, d_k, d_v)
        out = jnp.transpose(out, (0, 2, 1))  # torch.transpose(enc_output, 1, 2)
    return out


# ----------------------------------------------------------------------------
# Deterministic synthetic parameters
# ----------------------------------------------------------------------------
def make_layer_params(key, d_model, d_inner, n_head, d_k, d_v):
    ks = jax.random.split(key, 16)

    def w(k, shape, s=0.1):
        return (s * jax.random.normal(k, shape)).astype(jnp.float32)

    return {
        "wq": w(ks[0], (d_model, n_head * d_k)),
        "bq": w(ks[1], (1, n_head * d_k), 0.05),
        "wk": w(ks[2], (d_model, n_head * d_k)),
        "bk": w(ks[3], (1, n_head * d_k), 0.05),
        "wv": w(ks[4], (d_model, n_head * d_v)),
        "bv": w(ks[5], (1, n_head * d_v), 0.05),
        "fcw": w(ks[6], (n_head * d_v, d_model)),
        "fcb": w(ks[7], (1, d_model), 0.05),
        "ln1g": 1.0 + w(ks[8], (1, d_model), 0.05),
        "ln1b": w(ks[9], (1, d_model), 0.05),
        "w1": w(ks[10], (d_model, d_inner)),
        "b1": w(ks[11], (1, d_inner), 0.05),
        "w2": w(ks[12], (d_inner, d_model)),
        "b2": w(ks[13], (1, d_model), 0.05),
        "ln2g": 1.0 + w(ks[14], (1, d_model), 0.05),
        "ln2b": w(ks[15], (1, d_model), 0.05),
    }


if __name__ == "__main__":
    # small shapes consistent with the module (the per-layer transpose(1,2)
    # requires seq_len == d_model for a multi-layer stack)
    B = 2
    window = 16       # seq length L
    n_multiv = 16
    d_model = 16
    d_inner = 32
    n_layers = 2
    n_head = 2
    d_k = 4
    d_v = 4

    key = jax.random.PRNGKey(0)
    kx, *kl = jax.random.split(key, 1 + n_layers)
    x = jax.random.normal(kx, (B, window, d_model), jnp.float32)

    layer_params = [
        make_layer_params(kl[i], d_model, d_inner, n_head, d_k, d_v)
        for i in range(n_layers)
    ]

    out = encoder_forward_pallas(x, layer_params, n_head=n_head, d_k=d_k, d_v=d_v)
    out = jax.block_until_ready(out)

    ref = encoder_forward_ref(x, layer_params, n_head=n_head, d_k=d_k, d_v=d_v)
    assert out.shape == (B, d_model, window), out.shape
    max_err = float(jnp.max(jnp.abs(out - ref)))
    # tolerance covers bf16 MXU rounding (mirrored in the reference) and the
    # f32 identity-contraction used for the in-kernel inter-layer transpose
    assert jnp.allclose(out, ref, rtol=5e-3, atol=5e-3), max_err

    print("KERNEL_OK")
</pallas_src>

<mosaic_0001>
module attributes {stable_mosaic.version = 11 : i64} {
  func.func @encoder_stack_kernel(%arg0: i32, %arg1: memref<2x16x16xf32, #tpu.memory_space<vmem>>, %arg2: memref<2x16x24xbf16, #tpu.memory_space<vmem>>, %arg3: memref<2x8x16xbf16, #tpu.memory_space<vmem>>, %arg4: memref<2x16x32xbf16, #tpu.memory_space<vmem>>, %arg5: memref<2x32x16xbf16, #tpu.memory_space<vmem>>, %arg6: memref<2x8x128xf32, #tpu.memory_space<vmem>>, %arg7: memref<32x32xf32, #tpu.memory_space<vmem>>, %arg8: memref<16x16xf32, #tpu.memory_space<vmem>>, %arg9: memref<2x16x16xf32, #tpu.memory_space<vmem>>) attributes {dimension_semantics = [#tpu.dimension_semantics<parallel>], iteration_bounds = array<i64: 1>, scalar_prefetch = 0 : i64, scratch_operands = 0 : i64, tpu.core_type = #tpu.core_type<tc>, window_params = [{transform_indices = @transform_0, window_bounds = array<i64: 2, 16, 16>}, {pipeline_mode = #tpu.pipeline_mode<synchronous>, transform_indices = @transform_1, window_bounds = array<i64: 2, 16, 24>}, {pipeline_mode = #tpu.pipeline_mode<synchronous>, transform_indices = @transform_2, window_bounds = array<i64: 2, 8, 16>}, {pipeline_mode = #tpu.pipeline_mode<synchronous>, transform_indices = @transform_3, window_bounds = array<i64: 2, 16, 32>}, {pipeline_mode = #tpu.pipeline_mode<synchronous>, transform_indices = @transform_4, window_bounds = array<i64: 2, 32, 16>}, {pipeline_mode = #tpu.pipeline_mode<synchronous>, transform_indices = @transform_5, window_bounds = array<i64: 2, 8, 128>}, {pipeline_mode = #tpu.pipeline_mode<synchronous>, transform_indices = @transform_6, window_bounds = array<i64: 32, 32>}, {pipeline_mode = #tpu.pipeline_mode<synchronous>, transform_indices = @transform_7, window_bounds = array<i64: 16, 16>}, {transform_indices = @transform_8, window_bounds = array<i64: 2, 16, 16>}]} {
    %c0 = arith.constant 0 : index
    %c0_0 = arith.constant 0 : index
    %0 = vector.load %arg7[%c0, %c0_0] : memref<32x32xf32, #tpu.memory_space<vmem>>, vector<32x32xf32>
    %c0_1 = arith.constant 0 : index
    %c0_2 = arith.constant 0 : index
    %1 = vector.load %arg8[%c0_1, %c0_2] : memref<16x16xf32, #tpu.memory_space<vmem>>, vector<16x16xf32>
    %c0_3 = arith.constant 0 : index
    %c0_4 = arith.constant 0 : index
    %c0_5 = arith.constant 0 : index
    %2 = vector.load %arg1[%c0_3, %c0_4, %c0_5] : memref<2x16x16xf32, #tpu.memory_space<vmem>>, vector<2x16x16xf32>
    %3 = vector.shape_cast %2 : vector<2x16x16xf32> to vector<32x16xf32>
    %c0_6 = arith.constant 0 : index
    %c0_7 = arith.constant 0 : index
    %c0_8 = arith.constant 0 : index
    %4 = vector.load %arg2[%c0_6, %c0_7, %c0_8] : memref<2x16x24xbf16, #tpu.memory_space<vmem>>, vector<1x16x24xbf16>
    %5 = vector.shape_cast %4 : vector<1x16x24xbf16> to vector<16x24xbf16>
    %c0_9 = arith.constant 0 : index
    %c0_10 = arith.constant 0 : index
    %c0_11 = arith.constant 0 : index
    %6 = vector.load %arg3[%c0_9, %c0_10, %c0_11] : memref<2x8x16xbf16, #tpu.memory_space<vmem>>, vector<1x8x16xbf16>
    %7 = vector.shape_cast %6 : vector<1x8x16xbf16> to vector<8x16xbf16>
    %c0_12 = arith.constant 0 : index
    %c0_13 = arith.constant 0 : index
    %c0_14 = arith.constant 0 : index
    %8 = vector.load %arg4[%c0_12, %c0_13, %c0_14] : memref<2x16x32xbf16, #tpu.memory_space<vmem>>, vector<1x16x32xbf16>
    %9 = vector.shape_cast %8 : vector<1x16x32xbf16> to vector<16x32xbf16>
    %c0_15 = arith.constant 0 : index
    %c0_16 = arith.constant 0 : index
    %c0_17 = arith.constant 0 : index
    %10 = vector.load %arg5[%c0_15, %c0_16, %c0_17] : memref<2x32x16xbf16, #tpu.memory_space<vmem>>, vector<1x32x16xbf16>
    %11 = vector.shape_cast %10 : vector<1x32x16xbf16> to vector<32x16xbf16>
    %c0_18 = arith.constant 0 : index
    %c0_19 = arith.constant 0 : index
    %c0_20 = arith.constant 0 : index
    %12 = vector.load %arg6[%c0_18, %c0_19, %c0_20] : memref<2x8x128xf32, #tpu.memory_space<vmem>>, vector<1x8x128xf32>
    %13 = vector.shape_cast %12 : vector<1x8x128xf32> to vector<8x128xf32>
    %14 = vector.extract_strided_slice %13 {offsets = [0, 0], sizes = [1, 24], strides = [1, 1]} : vector<8x128xf32> to vector<1x24xf32>
    %15 = vector.extract_strided_slice %13 {offsets = [1, 0], sizes = [1, 16], strides = [1, 1]} : vector<8x128xf32> to vector<1x16xf32>
    %16 = vector.extract_strided_slice %13 {offsets = [2, 0], sizes = [1, 16], strides = [1, 1]} : vector<8x128xf32> to vector<1x16xf32>
    %17 = vector.extract_strided_slice %13 {offsets = [3, 0], sizes = [1, 16], strides = [1, 1]} : vector<8x128xf32> to vector<1x16xf32>
    %18 = vector.extract_strided_slice %13 {offsets = [4, 0], sizes = [1, 32], strides = [1, 1]} : vector<8x128xf32> to vector<1x32xf32>
    %19 = vector.extract_strided_slice %13 {offsets = [5, 0], sizes = [1, 16], strides = [1, 1]} : vector<8x128xf32> to vector<1x16xf32>
    %20 = vector.extract_strided_slice %13 {offsets = [6, 0], sizes = [1, 16], strides = [1, 1]} : vector<8x128xf32> to vector<1x16xf32>
    %21 = vector.extract_strided_slice %13 {offsets = [7, 0], sizes = [1, 16], strides = [1, 1]} : vector<8x128xf32> to vector<1x16xf32>
    %22 = arith.truncf %3 : vector<32x16xf32> to vector<32x16xbf16>
    %cst = arith.constant dense<0.000000e+00> : vector<32x24xf32>
    %23 = tpu.matmul %22, %5, %cst {dimension_numbers = #tpu.dot_dimension_numbers<[1], [0], [0], [1], [0, 0, 1, 1], [], []>} : vector<32x16xbf16>, vector<16x24xbf16>, vector<32x24xf32> -> vector<32x24xf32>
    %24 = vector.broadcast %14 : vector<1x24xf32> to vector<32x24xf32>
    %25 = arith.addf %23, %24 : vector<32x24xf32>
    %26 = vector.extract_strided_slice %25 {offsets = [0, 0], sizes = [32, 8], strides = [1, 1]} : vector<32x24xf32> to vector<32x8xf32>
    %27 = arith.truncf %26 : vector<32x8xf32> to vector<32x8xbf16>
    %28 = vector.extract_strided_slice %25 {offsets = [0, 8], sizes = [32, 8], strides = [1, 1]} : vector<32x24xf32> to vector<32x8xf32>
    %29 = arith.truncf %28 : vector<32x8xf32> to vector<32x8xbf16>
    %30 = vector.extract_strided_slice %25 {offsets = [0, 16], sizes = [32, 8], strides = [1, 1]} : vector<32x24xf32> to vector<32x8xf32>
    %31 = arith.truncf %30 : vector<32x8xf32> to vector<32x8xbf16>
    %32 = vector.extract_strided_slice %27 {offsets = [0, 0], sizes = [32, 4], strides = [1, 1]} : vector<32x8xbf16> to vector<32x4xbf16>
    %33 = vector.extract_strided_slice %29 {offsets = [0, 0], sizes = [32, 4], strides = [1, 1]} : vector<32x8xbf16> to vector<32x4xbf16>
    %34 = vector.extract_strided_slice %31 {offsets = [0, 0], sizes = [32, 4], strides = [1, 1]} : vector<32x8xbf16> to vector<32x4xbf16>
    %cst_21 = arith.constant dense<0.000000e+00> : vector<32x32xf32>
    %35 = tpu.matmul %32, %33, %cst_21 {dimension_numbers = #tpu.dot_dimension_numbers<[1], [1], [0], [0], [0, 0, 1, 0], [], []>} : vector<32x4xbf16>, vector<32x4xbf16>, vector<32x32xf32> -> vector<32x32xf32>
    %36 = arith.addf %35, %0 : vector<32x32xf32>
    %cst_22 = arith.constant dense<0xFF800000> : vector<32xf32>
    %37 = vector.multi_reduction <maximumf>, %36, %cst_22 [1] : vector<32x32xf32> to vector<32xf32>
    %38 = vector.shape_cast %37 : vector<32xf32> to vector<32x1xf32>
    %39 = vector.broadcast %38 : vector<32x1xf32> to vector<32x32xf32>
    %40 = arith.subf %36, %39 : vector<32x32xf32>
    %41 = math.exp %40 : vector<32x32xf32>
    %cst_23 = arith.constant dense<0.000000e+00> : vector<32xf32>
    %42 = vector.multi_reduction <add>, %41, %cst_23 [1] : vector<32x32xf32> to vector<32xf32>
    %43 = vector.shape_cast %42 : vector<32xf32> to vector<32x1xf32>
    %44 = vector.broadcast %43 : vector<32x1xf32> to vector<32x32xf32>
    %45 = arith.divf %41, %44 : vector<32x32xf32>
    %46 = arith.truncf %45 : vector<32x32xf32> to vector<32x32xbf16>
    %cst_24 = arith.constant dense<0.000000e+00> : vector<32x4xf32>
    %47 = tpu.matmul %46, %34, %cst_24 {dimension_numbers = #tpu.dot_dimension_numbers<[1], [0], [0], [1], [0, 0, 1, 1], [], []>} : vector<32x32xbf16>, vector<32x4xbf16>, vector<32x4xf32> -> vector<32x4xf32>
    %48 = vector.extract_strided_slice %27 {offsets = [0, 4], sizes = [32, 4], strides = [1, 1]} : vector<32x8xbf16> to vector<32x4xbf16>
    %49 = vector.extract_strided_slice %29 {offsets = [0, 4], sizes = [32, 4], strides = [1, 1]} : vector<32x8xbf16> to vector<32x4xbf16>
    %50 = vector.extract_strided_slice %31 {offsets = [0, 4], sizes = [32, 4], strides = [1, 1]} : vector<32x8xbf16> to vector<32x4xbf16>
    %cst_25 = arith.constant dense<0.000000e+00> : vector<32x32xf32>
    %51 = tpu.matmul %48, %49, %cst_25 {dimension_numbers = #tpu.dot_dimension_numbers<[1], [1], [0], [0], [0, 0, 1, 0], [], []>} : vector<32x4xbf16>, vector<32x4xbf16>, vector<32x32xf32> -> vector<32x32xf32>
    %52 = arith.addf %51, %0 : vector<32x32xf32>
    %cst_26 = arith.constant dense<0xFF800000> : vector<32xf32>
    %53 = vector.multi_reduction <maximumf>, %52, %cst_26 [1] : vector<32x32xf32> to vector<32xf32>
    %54 = vector.shape_cast %53 : vector<32xf32> to vector<32x1xf32>
    %55 = vector.broadcast %54 : vector<32x1xf32> to vector<32x32xf32>
    %56 = arith.subf %52, %55 : vector<32x32xf32>
    %57 = math.exp %56 : vector<32x32xf32>
    %cst_27 = arith.constant dense<0.000000e+00> : vector<32xf32>
    %58 = vector.multi_reduction <add>, %57, %cst_27 [1] : vector<32x32xf32> to vector<32xf32>
    %59 = vector.shape_cast %58 : vector<32xf32> to vector<32x1xf32>
    %60 = vector.broadcast %59 : vector<32x1xf32> to vector<32x32xf32>
    %61 = arith.divf %57, %60 : vector<32x32xf32>
    %62 = arith.truncf %61 : vector<32x32xf32> to vector<32x32xbf16>
    %cst_28 = arith.constant dense<0.000000e+00> : vector<32x4xf32>
    %63 = tpu.matmul %62, %50, %cst_28 {dimension_numbers = #tpu.dot_dimension_numbers<[1], [0], [0], [1], [0, 0, 1, 1], [], []>} : vector<32x32xbf16>, vector<32x4xbf16>, vector<32x4xf32> -> vector<32x4xf32>
    %64 = tpu.concatenate %47, %63 in 1 : vector<32x4xf32>, vector<32x4xf32> -> vector<32x8xf32>
    %65 = arith.truncf %64 : vector<32x8xf32> to vector<32x8xbf16>
    %cst_29 = arith.constant dense<0.000000e+00> : vector<32x16xf32>
    %66 = tpu.matmul %65, %7, %cst_29 {dimension_numbers = #tpu.dot_dimension_numbers<[1], [0], [0], [1], [0, 0, 1, 1], [], []>} : vector<32x8xbf16>, vector<8x16xbf16>, vector<32x16xf32> -> vector<32x16xf32>
    %67 = vector.broadcast %15 : vector<1x16xf32> to vector<32x16xf32>
    %68 = arith.addf %66, %67 : vector<32x16xf32>
    %69 = arith.addf %68, %3 : vector<32x16xf32>
    %cst_30 = arith.constant dense<0.000000e+00> : vector<32xf32>
    %70 = vector.multi_reduction <add>, %69, %cst_30 [1] : vector<32x16xf32> to vector<32xf32>
    %71 = vector.shape_cast %70 : vector<32xf32> to vector<32x1xf32>
    %cst_31 = arith.constant 1.600000e+01 : f32
    %72 = vector.broadcast %cst_31 : f32 to vector<32x1xf32>
    %73 = arith.divf %71, %72 : vector<32x1xf32>
    %74 = vector.broadcast %73 : vector<32x1xf32> to vector<32x16xf32>
    %75 = arith.subf %69, %74 : vector<32x16xf32>
    %76 = arith.mulf %75, %75 : vector<32x16xf32>
    %cst_32 = arith.constant dense<0.000000e+00> : vector<32xf32>
    %77 = vector.multi_reduction <add>, %76, %cst_32 [1] : vector<32x16xf32> to vector<32xf32>
    %78 = vector.shape_cast %77 : vector<32xf32> to vector<32x1xf32>
    %cst_33 = arith.constant 1.600000e+01 : f32
    %79 = vector.broadcast %cst_33 : f32 to vector<32x1xf32>
    %80 = arith.divf %78, %79 : vector<32x1xf32>
    %81 = vector.broadcast %73 : vector<32x1xf32> to vector<32x16xf32>
    %82 = arith.subf %69, %81 : vector<32x16xf32>
    %cst_34 = arith.constant 9.99999974E-6 : f32
    %83 = vector.broadcast %cst_34 : f32 to vector<32x1xf32>
    %84 = arith.addf %80, %83 : vector<32x1xf32>
    %85 = math.rsqrt %84 : vector<32x1xf32>
    %86 = vector.broadcast %85 : vector<32x1xf32> to vector<32x16xf32>
    %87 = arith.mulf %82, %86 : vector<32x16xf32>
    %88 = vector.broadcast %16 : vector<1x16xf32> to vector<32x16xf32>
    %89 = arith.mulf %87, %88 : vector<32x16xf32>
    %90 = vector.broadcast %17 : vector<1x16xf32> to vector<32x16xf32>
    %91 = arith.addf %89, %90 : vector<32x16xf32>
    %92 = arith.truncf %91 : vector<32x16xf32> to vector<32x16xbf16>
    %cst_35 = arith.constant dense<0.000000e+00> : vector<32x32xf32>
    %93 = tpu.matmul %92, %9, %cst_35 {dimension_numbers = #tpu.dot_dimension_numbers<[1], [0], [0], [1], [0, 0, 1, 1], [], []>} : vector<32x16xbf16>, vector<16x32xbf16>, vector<32x32xf32> -> vector<32x32xf32>
    %94 = vector.broadcast %18 : vector<1x32xf32> to vector<32x32xf32>
    %95 = arith.addf %93, %94 : vector<32x32xf32>
    %cst_36 = arith.constant 0.000000e+00 : f32
    %96 = vector.broadcast %cst_36 : f32 to vector<32x32xf32>
    %97 = arith.maximumf %95, %96 : vector<32x32xf32>
    %98 = arith.truncf %97 : vector<32x32xf32> to vector<32x32xbf16>
    %cst_37 = arith.constant dense<0.000000e+00> : vector<32x16xf32>
    %99 = tpu.matmul %98, %11, %cst_37 {dimension_numbers = #tpu.dot_dimension_numbers<[1], [0], [0], [1], [0, 0, 1, 1], [], []>} : vector<32x32xbf16>, vector<32x16xbf16>, vector<32x16xf32> -> vector<32x16xf32>
    %100 = vector.broadcast %19 : vector<1x16xf32> to vector<32x16xf32>
    %101 = arith.addf %99, %100 : vector<32x16xf32>
    %102 = arith.addf %101, %91 : vector<32x16xf32>
    %cst_38 = arith.constant dense<0.000000e+00> : vector<32xf32>
    %103 = vector.multi_reduction <add>, %102, %cst_38 [1] : vector<32x16xf32> to vector<32xf32>
    %104 = vector.shape_cast %103 : vector<32xf32> to vector<32x1xf32>
    %cst_39 = arith.constant 1.600000e+01 : f32
    %105 = vector.broadcast %cst_39 : f32 to vector<32x1xf32>
    %106 = arith.divf %104, %105 : vector<32x1xf32>
    %107 = vector.broadcast %106 : vector<32x1xf32> to vector<32x16xf32>
    %108 = arith.subf %102, %107 : vector<32x16xf32>
    %109 = arith.mulf %108, %108 : vector<32x16xf32>
    %cst_40 = arith.constant dense<0.000000e+00> : vector<32xf32>
    %110 = vector.multi_reduction <add>, %109, %cst_40 [1] : vector<32x16xf32> to vector<32xf32>
    %111 = vector.shape_cast %110 : vector<32xf32> to vector<32x1xf32>
    %cst_41 = arith.constant 1.600000e+01 : f32
    %112 = vector.broadcast %cst_41 : f32 to vector<32x1xf32>
    %113 = arith.divf %111, %112 : vector<32x1xf32>
    %114 = vector.broadcast %106 : vector<32x1xf32> to vector<32x16xf32>
    %115 = arith.subf %102, %114 : vector<32x16xf32>
    %cst_42 = arith.constant 9.99999974E-6 : f32
    %116 = vector.broadcast %cst_42 : f32 to vector<32x1xf32>
    %117 = arith.addf %113, %116 : vector<32x1xf32>
    %118 = math.rsqrt %117 : vector<32x1xf32>
    %119 = vector.broadcast %118 : vector<32x1xf32> to vector<32x16xf32>
    %120 = arith.mulf %115, %119 : vector<32x16xf32>
    %121 = vector.broadcast %20 : vector<1x16xf32> to vector<32x16xf32>
    %122 = arith.mulf %120, %121 : vector<32x16xf32>
    %123 = vector.broadcast %21 : vector<1x16xf32> to vector<32x16xf32>
    %124 = arith.addf %122, %123 : vector<32x16xf32>
    %125 = vector.extract_strided_slice %124 {offsets = [0, 0], sizes = [16, 16], strides = [1, 1]} : vector<32x16xf32> to vector<16x16xf32>
    %cst_43 = arith.constant dense<0.000000e+00> : vector<16x16xf32>
    %126 = tpu.matmul %1, %125, %cst_43 {dimension_numbers = #tpu.dot_dimension_numbers<[1], [1], [0], [0], [0, 0, 1, 0], [], []>} : vector<16x16xf32>, vector<16x16xf32>, vector<16x16xf32> -> vector<16x16xf32>
    %127 = vector.extract_strided_slice %124 {offsets = [16, 0], sizes = [16, 16], strides = [1, 1]} : vector<32x16xf32> to vector<16x16xf32>
    %cst_44 = arith.constant dense<0.000000e+00> : vector<16x16xf32>
    %128 = tpu.matmul %1, %127, %cst_44 {dimension_numbers = #tpu.dot_dimension_numbers<[1], [1], [0], [0], [0, 0, 1, 0], [], []>} : vector<16x16xf32>, vector<16x16xf32>, vector<16x16xf32> -> vector<16x16xf32>
    %129 = tpu.concatenate %126, %128 in 0 : vector<16x16xf32>, vector<16x16xf32> -> vector<32x16xf32>
    %c1 = arith.constant 1 : index
    %c0_45 = arith.constant 0 : index
    %c0_46 = arith.constant 0 : index
    %130 = vector.load %arg2[%c1, %c0_45, %c0_46] : memref<2x16x24xbf16, #tpu.memory_space<vmem>>, vector<1x16x24xbf16>
    %131 = vector.shape_cast %130 : vector<1x16x24xbf16> to vector<16x24xbf16>
    %c1_47 = arith.constant 1 : index
    %c0_48 = arith.constant 0 : index
    %c0_49 = arith.constant 0 : index
    %132 = vector.load %arg3[%c1_47, %c0_48, %c0_49] : memref<2x8x16xbf16, #tpu.memory_space<vmem>>, vector<1x8x16xbf16>
    %133 = vector.shape_cast %132 : vector<1x8x16xbf16> to vector<8x16xbf16>
    %c1_50 = arith.constant 1 : index
    %c0_51 = arith.constant 0 : index
    %c0_52 = arith.constant 0 : index
    %134 = vector.load %arg4[%c1_50, %c0_51, %c0_52] : memref<2x16x32xbf16, #tpu.memory_space<vmem>>, vector<1x16x32xbf16>
    %135 = vector.shape_cast %134 : vector<1x16x32xbf16> to vector<16x32xbf16>
    %c1_53 = arith.constant 1 : index
    %c0_54 = arith.constant 0 : index
    %c0_55 = arith.constant 0 : index
    %136 = vector.load %arg5[%c1_53, %c0_54, %c0_55] : memref<2x32x16xbf16, #tpu.memory_space<vmem>>, vector<1x32x16xbf16>
    %137 = vector.shape_cast %136 : vector<1x32x16xbf16> to vector<32x16xbf16>
    %c1_56 = arith.constant 1 : index
    %c0_57 = arith.constant 0 : index
    %c0_58 = arith.constant 0 : index
    %138 = vector.load %arg6[%c1_56, %c0_57, %c0_58] : memref<2x8x128xf32, #tpu.memory_space<vmem>>, vector<1x8x128xf32>
    %139 = vector.shape_cast %138 : vector<1x8x128xf32> to vector<8x128xf32>
    %140 = vector.extract_strided_slice %139 {offsets = [0, 0], sizes = [1, 24], strides = [1, 1]} : vector<8x128xf32> to vector<1x24xf32>
    %141 = vector.extract_strided_slice %139 {offsets = [1, 0], sizes = [1, 16], strides = [1, 1]} : vector<8x128xf32> to vector<1x16xf32>
    %142 = vector.extract_strided_slice %139 {offsets = [2, 0], sizes = [1, 16], strides = [1, 1]} : vector<8x128xf32> to vector<1x16xf32>
    %143 = vector.extract_strided_slice %139 {offsets = [3, 0], sizes = [1, 16], strides = [1, 1]} : vector<8x128xf32> to vector<1x16xf32>
    %144 = vector.extract_strided_slice %139 {offsets = [4, 0], sizes = [1, 32], strides = [1, 1]} : vector<8x128xf32> to vector<1x32xf32>
    %145 = vector.extract_strided_slice %139 {offsets = [5, 0], sizes = [1, 16], strides = [1, 1]} : vector<8x128xf32> to vector<1x16xf32>
    %146 = vector.extract_strided_slice %139 {offsets = [6, 0], sizes = [1, 16], strides = [1, 1]} : vector<8x128xf32> to vector<1x16xf32>
    %147 = vector.extract_strided_slice %139 {offsets = [7, 0], sizes = [1, 16], strides = [1, 1]} : vector<8x128xf32> to vector<1x16xf32>
    %148 = arith.truncf %129 : vector<32x16xf32> to vector<32x16xbf16>
    %cst_59 = arith.constant dense<0.000000e+00> : vector<32x24xf32>
    %149 = tpu.matmul %148, %131, %cst_59 {dimension_numbers = #tpu.dot_dimension_numbers<[1], [0], [0], [1], [0, 0, 1, 1], [], []>} : vector<32x16xbf16>, vector<16x24xbf16>, vector<32x24xf32> -> vector<32x24xf32>
    %150 = vector.broadcast %140 : vector<1x24xf32> to vector<32x24xf32>
    %151 = arith.addf %149, %150 : vector<32x24xf32>
    %152 = vector.extract_strided_slice %151 {offsets = [0, 0], sizes = [32, 8], strides = [1, 1]} : vector<32x24xf32> to vector<32x8xf32>
    %153 = arith.truncf %152 : vector<32x8xf32> to vector<32x8xbf16>
    %154 = vector.extract_strided_slice %151 {offsets = [0, 8], sizes = [32, 8], strides = [1, 1]} : vector<32x24xf32> to vector<32x8xf32>
    %155 = arith.truncf %154 : vector<32x8xf32> to vector<32x8xbf16>
    %156 = vector.extract_strided_slice %151 {offsets = [0, 16], sizes = [32, 8], strides = [1, 1]} : vector<32x24xf32> to vector<32x8xf32>
    %157 = arith.truncf %156 : vector<32x8xf32> to vector<32x8xbf16>
    %158 = vector.extract_strided_slice %153 {offsets = [0, 0], sizes = [32, 4], strides = [1, 1]} : vector<32x8xbf16> to vector<32x4xbf16>
    %159 = vector.extract_strided_slice %155 {offsets = [0, 0], sizes = [32, 4], strides = [1, 1]} : vector<32x8xbf16> to vector<32x4xbf16>
    %160 = vector.extract_strided_slice %157 {offsets = [0, 0], sizes = [32, 4], strides = [1, 1]} : vector<32x8xbf16> to vector<32x4xbf16>
    %cst_60 = arith.constant dense<0.000000e+00> : vector<32x32xf32>
    %161 = tpu.matmul %158, %159, %cst_60 {dimension_numbers = #tpu.dot_dimension_numbers<[1], [1], [0], [0], [0, 0, 1, 0], [], []>} : vector<32x4xbf16>, vector<32x4xbf16>, vector<32x32xf32> -> vector<32x32xf32>
    %162 = arith.addf %161, %0 : vector<32x32xf32>
    %cst_61 = arith.constant dense<0xFF800000> : vector<32xf32>
    %163 = vector.multi_reduction <maximumf>, %162, %cst_61 [1] : vector<32x32xf32> to vector<32xf32>
    %164 = vector.shape_cast %163 : vector<32xf32> to vector<32x1xf32>
    %165 = vector.broadcast %164 : vector<32x1xf32> to vector<32x32xf32>
    %166 = arith.subf %162, %165 : vector<32x32xf32>
    %167 = math.exp %166 : vector<32x32xf32>
    %cst_62 = arith.constant dense<0.000000e+00> : vector<32xf32>
    %168 = vector.multi_reduction <add>, %167, %cst_62 [1] : vector<32x32xf32> to vector<32xf32>
    %169 = vector.shape_cast %168 : vector<32xf32> to vector<32x1xf32>
    %170 = vector.broadcast %169 : vector<32x1xf32> to vector<32x32xf32>
    %171 = arith.divf %167, %170 : vector<32x32xf32>
    %172 = arith.truncf %171 : vector<32x32xf32> to vector<32x32xbf16>
    %cst_63 = arith.constant dense<0.000000e+00> : vector<32x4xf32>
    %173 = tpu.matmul %172, %160, %cst_63 {dimension_numbers = #tpu.dot_dimension_numbers<[1], [0], [0], [1], [0, 0, 1, 1], [], []>} : vector<32x32xbf16>, vector<32x4xbf16>, vector<32x4xf32> -> vector<32x4xf32>
    %174 = vector.extract_strided_slice %153 {offsets = [0, 4], sizes = [32, 4], strides = [1, 1]} : vector<32x8xbf16> to vector<32x4xbf16>
    %175 = vector.extract_strided_slice %155 {offsets = [0, 4], sizes = [32, 4], strides = [1, 1]} : vector<32x8xbf16> to vector<32x4xbf16>
    %176 = vector.extract_strided_slice %157 {offsets = [0, 4], sizes = [32, 4], strides = [1, 1]} : vector<32x8xbf16> to vector<32x4xbf16>
    %cst_64 = arith.constant dense<0.000000e+00> : vector<32x32xf32>
    %177 = tpu.matmul %174, %175, %cst_64 {dimension_numbers = #tpu.dot_dimension_numbers<[1], [1], [0], [0], [0, 0, 1, 0], [], []>} : vector<32x4xbf16>, vector<32x4xbf16>, vector<32x32xf32> -> vector<32x32xf32>
    %178 = arith.addf %177, %0 : vector<32x32xf32>
    %cst_65 = arith.constant dense<0xFF800000> : vector<32xf32>
    %179 = vector.multi_reduction <maximumf>, %178, %cst_65 [1] : vector<32x32xf32> to vector<32xf32>
    %180 = vector.shape_cast %179 : vector<32xf32> to vector<32x1xf32>
    %181 = vector.broadcast %180 : vector<32x1xf32> to vector<32x32xf32>
    %182 = arith.subf %178, %181 : vector<32x32xf32>
    %183 = math.exp %182 : vector<32x32xf32>
    %cst_66 = arith.constant dense<0.000000e+00> : vector<32xf32>
    %184 = vector.multi_reduction <add>, %183, %cst_66 [1] : vector<32x32xf32> to vector<32xf32>
    %185 = vector.shape_cast %184 : vector<32xf32> to vector<32x1xf32>
    %186 = vector.broadcast %185 : vector<32x1xf32> to vector<32x32xf32>
    %187 = arith.divf %183, %186 : vector<32x32xf32>
    %188 = arith.truncf %187 : vector<32x32xf32> to vector<32x32xbf16>
    %cst_67 = arith.constant dense<0.000000e+00> : vector<32x4xf32>
    %189 = tpu.matmul %188, %176, %cst_67 {dimension_numbers = #tpu.dot_dimension_numbers<[1], [0], [0], [1], [0, 0, 1, 1], [], []>} : vector<32x32xbf16>, vector<32x4xbf16>, vector<32x4xf32> -> vector<32x4xf32>
    %190 = tpu.concatenate %173, %189 in 1 : vector<32x4xf32>, vector<32x4xf32> -> vector<32x8xf32>
    %191 = arith.truncf %190 : vector<32x8xf32> to vector<32x8xbf16>
    %cst_68 = arith.constant dense<0.000000e+00> : vector<32x16xf32>
    %192 = tpu.matmul %191, %133, %cst_68 {dimension_numbers = #tpu.dot_dimension_numbers<[1], [0], [0], [1], [0, 0, 1, 1], [], []>} : vector<32x8xbf16>, vector<8x16xbf16>, vector<32x16xf32> -> vector<32x16xf32>
    %193 = vector.broadcast %141 : vector<1x16xf32> to vector<32x16xf32>
    %194 = arith.addf %192, %193 : vector<32x16xf32>
    %195 = arith.addf %194, %129 : vector<32x16xf32>
    %cst_69 = arith.constant dense<0.000000e+00> : vector<32xf32>
    %196 = vector.multi_reduction <add>, %195, %cst_69 [1] : vector<32x16xf32> to vector<32xf32>
    %197 = vector.shape_cast %196 : vector<32xf32> to vector<32x1xf32>
    %cst_70 = arith.constant 1.600000e+01 : f32
    %198 = vector.broadcast %cst_70 : f32 to vector<32x1xf32>
    %199 = arith.divf %197, %198 : vector<32x1xf32>
    %200 = vector.broadcast %199 : vector<32x1xf32> to vector<32x16xf32>
    %201 = arith.subf %195, %200 : vector<32x16xf32>
    %202 = arith.mulf %201, %201 : vector<32x16xf32>
    %cst_71 = arith.constant dense<0.000000e+00> : vector<32xf32>
    %203 = vector.multi_reduction <add>, %202, %cst_71 [1] : vector<32x16xf32> to vector<32xf32>
    %204 = vector.shape_cast %203 : vector<32xf32> to vector<32x1xf32>
    %cst_72 = arith.constant 1.600000e+01 : f32
    %205 = vector.broadcast %cst_72 : f32 to vector<32x1xf32>
    %206 = arith.divf %204, %205 : vector<32x1xf32>
    %207 = vector.broadcast %199 : vector<32x1xf32> to vector<32x16xf32>
    %208 = arith.subf %195, %207 : vector<32x16xf32>
    %cst_73 = arith.constant 9.99999974E-6 : f32
    %209 = vector.broadcast %cst_73 : f32 to vector<32x1xf32>
    %210 = arith.addf %206, %209 : vector<32x1xf32>
    %211 = math.rsqrt %210 : vector<32x1xf32>
    %212 = vector.broadcast %211 : vector<32x1xf32> to vector<32x16xf32>
    %213 = arith.mulf %208, %212 : vector<32x16xf32>
    %214 = vector.broadcast %142 : vector<1x16xf32> to vector<32x16xf32>
    %215 = arith.mulf %213, %214 : vector<32x16xf32>
    %216 = vector.broadcast %143 : vector<1x16xf32> to vector<32x16xf32>
    %217 = arith.addf %215, %216 : vector<32x16xf32>
    %218 = arith.truncf %217 : vector<32x16xf32> to vector<32x16xbf16>
    %cst_74 = arith.constant dense<0.000000e+00> : vector<32x32xf32>
    %219 = tpu.matmul %218, %135, %cst_74 {dimension_numbers = #tpu.dot_dimension_numbers<[1], [0], [0], [1], [0, 0, 1, 1], [], []>} : vector<32x16xbf16>, vector<16x32xbf16>, vector<32x32xf32> -> vector<32x32xf32>
    %220 = vector.broadcast %144 : vector<1x32xf32> to vector<32x32xf32>
    %221 = arith.addf %219, %220 : vector<32x32xf32>
    %cst_75 = arith.constant 0.000000e+00 : f32
    %222 = vector.broadcast %cst_75 : f32 to vector<32x32xf32>
    %223 = arith.maximumf %221, %222 : vector<32x32xf32>
    %224 = arith.truncf %223 : vector<32x32xf32> to vector<32x32xbf16>
    %cst_76 = arith.constant dense<0.000000e+00> : vector<32x16xf32>
    %225 = tpu.matmul %224, %137, %cst_76 {dimension_numbers = #tpu.dot_dimension_numbers<[1], [0], [0], [1], [0, 0, 1, 1], [], []>} : vector<32x32xbf16>, vector<32x16xbf16>, vector<32x16xf32> -> vector<32x16xf32>
    %226 = vector.broadcast %145 : vector<1x16xf32> to vector<32x16xf32>
    %227 = arith.addf %225, %226 : vector<32x16xf32>
    %228 = arith.addf %227, %217 : vector<32x16xf32>
    %cst_77 = arith.constant dense<0.000000e+00> : vector<32xf32>
    %229 = vector.multi_reduction <add>, %228, %cst_77 [1] : vector<32x16xf32> to vector<32xf32>
    %230 = vector.shape_cast %229 : vector<32xf32> to vector<32x1xf32>
    %cst_78 = arith.constant 1.600000e+01 : f32
    %231 = vector.broadcast %cst_78 : f32 to vector<32x1xf32>
    %232 = arith.divf %230, %231 : vector<32x1xf32>
    %233 = vector.broadcast %232 : vector<32x1xf32> to vector<32x16xf32>
    %234 = arith.subf %228, %233 : vector<32x16xf32>
    %235 = arith.mulf %234, %234 : vector<32x16xf32>
    %cst_79 = arith.constant dense<0.000000e+00> : vector<32xf32>
    %236 = vector.multi_reduction <add>, %235, %cst_79 [1] : vector<32x16xf32> to vector<32xf32>
    %237 = vector.shape_cast %236 : vector<32xf32> to vector<32x1xf32>
    %cst_80 = arith.constant 1.600000e+01 : f32
    %238 = vector.broadcast %cst_80 : f32 to vector<32x1xf32>
    %239 = arith.divf %237, %238 : vector<32x1xf32>
    %240 = vector.broadcast %232 : vector<32x1xf32> to vector<32x16xf32>
    %241 = arith.subf %228, %240 : vector<32x16xf32>
    %cst_81 = arith.constant 9.99999974E-6 : f32
    %242 = vector.broadcast %cst_81 : f32 to vector<32x1xf32>
    %243 = arith.addf %239, %242 : vector<32x1xf32>
    %244 = math.rsqrt %243 : vector<32x1xf32>
    %245 = vector.broadcast %244 : vector<32x1xf32> to vector<32x16xf32>
    %246 = arith.mulf %241, %245 : vector<32x16xf32>
    %247 = vector.broadcast %146 : vector<1x16xf32> to vector<32x16xf32>
    %248 = arith.mulf %246, %247 : vector<32x16xf32>
    %249 = vector.broadcast %147 : vector<1x16xf32> to vector<32x16xf32>
    %250 = arith.addf %248, %249 : vector<32x16xf32>
    %251 = vector.shape_cast %250 : vector<32x16xf32> to vector<2x16x16xf32>
    %c0_82 = arith.constant 0 : index
    %c0_83 = arith.constant 0 : index
    %c0_84 = arith.constant 0 : index
    %252 = vector.load %arg9[%c0_82, %c0_83, %c0_84] : memref<2x16x16xf32, #tpu.memory_space<vmem>>, vector<2x16x16xf32>
    tpu.vector_store %arg9[%c0_82, %c0_83, %c0_84], %251 {strides = array<i32>} : memref<2x16x16xf32, #tpu.memory_space<vmem>>, vector<2x16x16xf32>,
    return
  }
  func.func @transform_0(%arg0: i32) -> (i32, i32, i32) {
    %c0_i32 = arith.constant 0 : i32
    %c0_i32_0 = arith.constant 0 : i32
    %c0_i32_1 = arith.constant 0 : i32
    return %arg0, %c0_i32, %c0_i32_0 : i32, i32, i32
  }
  func.func @transform_1(%arg0: i32) -> (i32, i32, i32) {
    %c0_i32 = arith.constant 0 : i32
    %c0_i32_0 = arith.constant 0 : i32
    %c0_i32_1 = arith.constant 0 : i32
    %c0_i32_2 = arith.constant 0 : i32
    return %c0_i32, %c0_i32_0, %c0_i32_1 : i32, i32, i32
  }
  func.func @transform_2(%arg0: i32) -> (i32, i32, i32) {
    %c0_i32 = arith.constant 0 : i32
    %c0_i32_0 = arith.constant 0 : i32
    %c0_i32_1 = arith.constant 0 : i32
    %c0_i32_2 = arith.constant 0 : i32
    return %c0_i32, %c0_i32_0, %c0_i32_1 : i32, i32, i32
  }
  func.func @transform_3(%arg0: i32) -> (i32, i32, i32) {
    %c0_i32 = arith.constant 0 : i32
    %c0_i32_0 = arith.constant 0 : i32
    %c0_i32_1 = arith.constant 0 : i32
    %c0_i32_2 = arith.constant 0 : i32
    return %c0_i32, %c0_i32_0, %c0_i32_1 : i32, i32, i32
  }
  func.func @transform_4(%arg0: i32) -> (i32, i32, i32) {
    %c0_i32 = arith.constant 0 : i32
    %c0_i32_0 = arith.constant 0 : i32
    %c0_i32_1 = arith.constant 0 : i32
    %c0_i32_2 = arith.constant 0 : i32
    return %c0_i32, %c0_i32_0, %c0_i32_1 : i32, i32, i32
  }
  func.func @transform_5(%arg0: i32) -> (i32, i32, i32) {
    %c0_i32 = arith.constant 0 : i32
    %c0_i32_0 = arith.constant 0 : i32
    %c0_i32_1 = arith.constant 0 : i32
    %c0_i32_2 = arith.constant 0 : i32
    return %c0_i32, %c0_i32_0, %c0_i32_1 : i32, i32, i32
  }
  func.func @transform_6(%arg0: i32) -> (i32, i32) {
    %c0_i32 = arith.constant 0 : i32
    %c0_i32_0 = arith.constant 0 : i32
    %c0_i32_1 = arith.constant 0 : i32
    return %c0_i32, %c0_i32_0 : i32, i32
  }
  func.func @transform_7(%arg0: i32) -> (i32, i32) {
    %c0_i32 = arith.constant 0 : i32
    %c0_i32_0 = arith.constant 0 : i32
    %c0_i32_1 = arith.constant 0 : i32
    return %c0_i32, %c0_i32_0 : i32, i32
  }
  func.func @transform_8(%arg0: i32) -> (i32, i32, i32) {
    %c0_i32 = arith.constant 0 : i32
    %c0_i32_0 = arith.constant 0 : i32
    %c0_i32_1 = arith.constant 0 : i32
    return %arg0, %c0_i32, %c0_i32_0 : i32, i32, i32
  }
}

</mosaic_0001>

<bundles_post_ra>
// kernel: tpu_custom_call.1
= control target key start
LH: loop header
LB: loop body
LE: loop exit
PB: predicated region body
PF: predicated region fallthrough
CT: control target
= control target key end

     0   :  { %13 = vsyncpa [#allocation3], 0  ;;  %s2644_s0 = inlined_call_operand.vmem [shape: f32[2,16,16], index: 0, kind: input, shape index: {}]   ;;  %s2645_s1 = inlined_call_operand.vmem [shape: bf16[2,16,24], index: 1, kind: input, shape index: {}]   ;;  %s2646_s2 = inlined_call_operand.hbm [shape: bf16[2,8,16], index: 2, kind: input, shape index: {}]   ;;  %s2647_s3 = inlined_call_operand.hbm [shape: bf16[2,16,32], index: 3, kind: input, shape index: {}]   ;;  %s2648_s4 = inlined_call_operand.vmem [shape: bf16[2,32,16], index: 4, kind: input, shape index: {}]   ;;  %s2649_s5 = inlined_call_operand.hbm [shape: f32[2,8,128], index: 5, kind: input, shape index: {}]   ;;  %s2650_s6 = inlined_call_operand.hbm [shape: f32[32,32], index: 6, kind: input, shape index: {}]   ;;  %s2651_s7 = inlined_call_operand.hbm [shape: f32[16,16], index: 7, kind: input, shape index: {}]   ;;  %s2652_s8 = inlined_call_operand.hbm [shape: f32[2,16,16], index: 8, kind: output, shape index: {}]  }
   0x1   :  { %14 = vsyncpa [#allocation6], 0 }
   0x2   :  { %15 = vsyncpa [#allocation9], 0 }
   0x3   :  { %16 = vsyncpa [#allocation4], 0  ;;  %s38_s29 = sshll.u32 %s2647_s3, 4  ;;  %s2049_s30 = smov [#allocation5]   ;;  %s39_s29 = int_to_ptr.hbm [resolvable:$true] %s38_s29 }
   0x4   :  { %s40_s9 = sshll.u32 %s2049_s30, 4  ;;  %s2050_s10 = smov 64   ;;  %s41_s9 = int_to_ptr.vmem [resolvable:$true] %s40_s9 }
   0x5   :  { %s2051_s11 = smov 4   ;;  %s66_s14 = sshll.u32 %s2650_s6, 4  ;;  %s67_s14 = int_to_ptr.hbm [resolvable:$true] %s66_s14 }
   0x6   :  { %46 = dma.hbm_to_vmem [thread:$0]  %s39_s29, 256, %s41_s9, [#allocation6], %s2050_s10, %s2050_s10, %s2051_s11  }
   0x7   :  { %s2052_s15 = smov [#allocation8]   ;;  %s25_s19 = sshll.u32 %s2646_s2, 4  ;;  %s26_s19 = int_to_ptr.hbm [resolvable:$true] %s25_s19 }
   0x8   :  { %s68_s16 = sshll.u32 %s2052_s15, 4  ;;  %s2053_s3 = smov 128   ;;  %s69_s16 = int_to_ptr.vmem [resolvable:$true] %s68_s16 }
   0x9   :  { %s2054_s20 = smov 8   ;;  %s53_s23 = sshll.u32 %s2649_s5, 4  ;;  %s54_s23 = int_to_ptr.hbm [resolvable:$true] %s53_s23 }
   0xa   :  { %74 = dma.hbm_to_vmem [thread:$0]  %s67_s14, 512, %s69_s16, [#allocation9], %s2053_s3, %s2053_s3, %s2054_s20  }
   0xb   :  { %s2055_s6 = smov [#allocation2]   ;;  %s2056_s25 = smov [#allocation7]  }
   0xc   :  { %s27_s24 = sshll.u32 %s2055_s6, 4  ;;  %s55_s2 = sshll.u32 %s2056_s25, 4  ;;  %s28_s24 = int_to_ptr.vmem [resolvable:$true] %s27_s24  ;;  %s56_s2 = int_to_ptr.vmem [resolvable:$true] %s55_s2 }
   0xd   :  { %33 = dma.hbm_to_vmem [thread:$0]  %s26_s19, 128, %s28_s24, [#allocation3], %s2050_s10, %s2050_s10, %s2051_s11  }
   0xe   :  { %s79_s28 = sshll.u32 %s2651_s7, 4  ;;  %s2057_s29 = smov [#allocation10]   ;;  %s80_s28 = int_to_ptr.hbm [resolvable:$true] %s79_s28 }
   0xf   :  { %61 = dma.hbm_to_vmem [thread:$0]  %s54_s23, 256, %s56_s2, [#allocation6], %s2053_s3, %s2053_s3, %s2054_s20  }
  0x10   :  { %s81_s5 = sshll.u32 %s2057_s29, 4  ;;  %s82_s5 = int_to_ptr.vmem [resolvable:$true] %s81_s5 }
  0x11   :  { %87 = dma.hbm_to_vmem [thread:$0]  %s80_s28, 256, %s82_s5, [#allocation9], %s2053_s3, %s2053_s3, %s2054_s20  }
  0x12   :  { %2041 = dma.done.wait [#allocation3], 128  }
  0x13   :  { %2042 = vsyncadd [#allocation3], 4294967168 }
  0x14   :  { %2043 = dma.done.wait [#allocation6], 512  }
  0x15   :  { %2044 = vsyncadd [#allocation6], 4294966784 }
  0x16   :  { %2045 = dma.done.wait [#allocation9], 768  }
  0x17   :  { %2046 = vsyncadd [#allocation9], 4294966528  ;;  %v1749_v0 = vld [vmem:[%s2645_s1] sm:$0xff]  ;;  %v2147_v2 = vld [vmem:[%s2644_s0 + $0x8] sm:$0xff]  ;;  %vm138_vm0 = vcmask 130048   ;;  %s2059_s18 = smov 120  }
  0x18   :  { %v2142_v1 = vld [vmem:[%s2644_s0] sm:$0xff]  ;;  %152 = vmatpush.bf16.msra.mxu0 %v1749_v0  ;;  %v2155_v4 = vld [vmem:[%s2644_s0 + $0x10] sm:$0xff]  ;;  %v2160_v5 = vld [vmem:[%s2644_s0 + $0x18] sm:$0xff]  ;;  %s2058_s0 = smov 124   ;;  %s2060_s19 = smov 116   ;;  %vm182_vm1 = vcmask 31744  }
  0x19   :  { %v129_v3 = vpack.c.bf16 %v2147_v2, %v2142_v1  ;;  %v130_v6 = vpack.c.bf16 %v2160_v5, %v2155_v4  ;;  %v2165_v7 = vld [vmem:[#allocation7] sm:$0xff]  ;;  %vm214_vm2 = vcmask 261120   ;;  %v109_v43 = vld [vmem:[#allocation8] sm:$0xff]  ;;  %v110_v48 = vld [vmem:[#allocation8 + $0x8] sm:$0xff]  ;;  %s2061_s21 = smov 108   ;;  %s2062_s22 = smov 112  }
  0x1a   :  { %v131_v9 = vperm.slane %v2165_v7, 0  ;;  %v111_v39 = vld [vmem:[#allocation8 + $0x10] sm:$0xff]  ;;  %v112_v53 = vld [vmem:[#allocation8 + $0x18] sm:$0xff]  ;;  %s1656_s30 = sshll.u32 %s2652_s8, 4  ;;  %s1657_s30 = int_to_ptr.hbm [resolvable:$true] %s1656_s30 }
  0x1b   :  { %1675 = vmatmul.msk.bf16.vlgmr.msra.gmra.mxu0 %vm138_vm0, %v129_v3 }
  0x2b   :  { %1676 = vmatmul.msk.bf16.gmra.mxu0 %vm138_vm0, %v130_v6 }
  0x98   :  { %v154_v8 = vpop.f32.mrf.mxu0 }
  0x99   :  { %v155_v10 = vadd.f32 %v154_v8, %v131_v9 }
  0x9b   :  { %v164_v12 = vpack.c.bf16 %v155_v10, %v155_v10 }
  0x9d   :  { %v172_v15 = vunpack.c.l.b16 %v164_v12 }
  0xa0   :  { %v156_v11 = vpop.f32.mrf.mxu0 }
  0xa1   :  { %v157_v13 = vadd.f32 %v156_v11, %v131_v9 }
  0xa3   :  { %v165_v14 = vpack.c.bf16 %v157_v13, %v157_v13 }
  0xa5   :  { %v173_v16 = vunpack.c.l.b16 %v165_v14 }
  0xa7   :  { %v2168_v17 = vpack.c.b16 %v173_v16, %v172_v15 }
  0xa8   :  { %v159_v18 = vpop.f32.mrf.mxu0 }
  0xa9   :  { %344 = vrot.lane.b32.xlu1 %v2168_v17, %s2058_s0  ;;  %v160_v19 = vadd.f32 %v159_v18, %v131_v9 }
  0xab   :  { %v166_v21 = vpack.c.bf16 %v160_v19, %v160_v19 }
  0xad   :  { %v174_v24 = vunpack.c.l.b16 %v166_v21 }
  0xb0   :  { %v161_v20 = vpop.f32.mrf.mxu0 }
  0xb1   :  { %v162_v22 = vadd.f32 %v161_v20, %v131_v9 }
  0xb3   :  { %v167_v23 = vpack.c.bf16 %v162_v22, %v162_v22 }
  0xb5   :  { %v175_v25 = vunpack.c.l.b16 %v167_v23 }
  0xb7   :  { %v2172_v26 = vpack.c.b16 %v175_v25, %v174_v24 }
  0xb9   :  { %180 = vrot.lane.b32.xlu2 %v2172_v26, %s2059_s18  ;;  %350 = vrot.lane.b32.xlu0 %v2172_v26, %s2060_s19 }
  0xba   :  { %346 = vrot.lane.b32.xlu1 %v2172_v26, %s2058_s0 }
  0xc1   :  { %178 = vrot.lane.b32.xlu2 %v2168_v17, %s2059_s18  ;;  %348 = vrot.lane.b32.xlu0 %v2168_v17, %s2060_s19 }
 0x113   :  { %v181_v27 = vpop.permute.xlu2 %180 }
 0x114   :  { %v193_v28 = vsel %vm182_vm1, %v181_v27, 0 }
 0x115   :  { %201 = vmatpush.bf16.xpose.msra.mxu1 %v193_v28 }
 0x11b   :  { %v179_v29 = vpop.permute.xlu2 %178  ;;  %v345_v35 = vpop.permute.xlu1 %344 }
 0x11c   :  { %v190_v30 = vsel %vm182_vm1, %v179_v29, 0 }
 0x11d   :  { %202 = vmatpush.bf16.xpose.msra.mxu1 %v190_v30 }
 0x124   :  { %1677 = vmatmul.msk.bf16.vlgmr.msra.gmra.mxu1 %vm182_vm1, %v2168_v17 }
 0x12b   :  { %v351_v31 = vpop.permute.xlu0 %350 }
 0x12c   :  { %v362_v32 = vsel %vm182_vm1, %v351_v31, 0  ;;  %v347_v36 = vpop.permute.xlu1 %346 }
 0x12d   :  { %370 = vmatpush.bf16.xpose.msra.mxu3 %v362_v32 }
 0x133   :  { %v349_v33 = vpop.permute.xlu0 %348 }
 0x134   :  { %1678 = vmatmul.msk.bf16.gmra.mxu1 %vm182_vm1, %v2172_v26  ;;  %v359_v34 = vsel %vm182_vm1, %v349_v33, 0 }
 0x135   :  { %371 = vmatpush.bf16.xpose.msra.mxu3 %v359_v34 }
 0x13c   :  { %1681 = vmatmul.msk.bf16.vlgmr.msra.gmra.mxu3 %vm182_vm1, %v345_v35 }
 0x14c   :  { %1682 = vmatmul.msk.bf16.gmra.mxu3 %vm182_vm1, %v347_v36 }
 0x1a1   :  { %v204_v37 = vpop.f32.mrf.mxu1 }
 0x1a2   :  { %v205_v47 = vadd.f32 %v204_v37, %v109_v43 }
 0x1a4   :  { %v215_v52 = vsel %vm214_vm2, %v205_v47, -inf }
 0x1a9   :  { %v206_v38 = vpop.f32.mrf.mxu1 }
 0x1aa   :  { %v207_v55 = vadd.f32 %v206_v38, %v110_v48 }
 0x1ac   :  { %v218_v60 = vsel %vm214_vm2, %v207_v55, -inf }
 0x1b1   :  { %v209_v40 = vpop.f32.mrf.mxu1 }
 0x1b2   :  { %v2194_v41 = vadd.f32 %v209_v40, %v111_v39 }
 0x1b4   :  { %v221_v42 = vsel %vm214_vm2, %v2194_v41, -inf }
 0x1b5   :  { %222 = vmax.xlane.f32.xlu2 %v221_v42 }
 0x1b9   :  { %v211_v54 = vpop.f32.mrf.mxu1 }
 0x1ba   :  { %v2201_v56 = vadd.f32 %v211_v54, %v112_v53 }
 0x1bc   :  { %v224_v61 = vsel %vm214_vm2, %v2201_v56, -inf }
 0x1bf   :  { %v373_v44 = vpop.f32.mrf.mxu3 }
 0x1c0   :  { %v374_v45 = vadd.f32 %v373_v44, %v109_v43 }
 0x1c2   :  { %v383_v46 = vsel %vm214_vm2, %v374_v45, -inf }
 0x1c3   :  { %384 = vmax.xlane.f32.xlu0 %v383_v46 }
 0x1c7   :  { %v375_v49 = vpop.f32.mrf.mxu3 }
 0x1c8   :  { %v376_v50 = vadd.f32 %v375_v49, %v110_v48 }
 0x1ca   :  { %v386_v51 = vsel %vm214_vm2, %v376_v50, -inf }
 0x1cb   :  { %387 = vmax.xlane.f32.xlu1 %v386_v51  ;;  %216 = vmax.xlane.f32.xlu0 %v215_v52 }
 0x1cf   :  { %v378_v57 = vpop.f32.mrf.mxu3 }
 0x1d0   :  { %v379_v58 = vadd.f32 %v378_v57, %v111_v39 }
 0x1d2   :  { %v389_v59 = vsel %vm214_vm2, %v379_v58, -inf }
 0x1d3   :  { %390 = vmax.xlane.f32.xlu2 %v389_v59  ;;  %219 = vmax.xlane.f32.xlu1 %v218_v60 }
 0x1d4   :  { %225 = vmax.xlane.f32.xlu0 %v224_v61 }
 0x1d7   :  { %v380_v62 = vpop.f32.mrf.mxu3 }
 0x1d8   :  { %v381_v63 = vadd.f32 %v380_v62, %v112_v53 }
 0x1da   :  { %v392_v0 = vsel %vm214_vm2, %v381_v63, -inf }
 0x1db   :  { %393 = vmax.xlane.f32.xlu2 %v392_v0 }
 0x1e8   :  { %483 = vrot.lane.b32.xlu0 %v2172_v26, %s2061_s21 }
 0x228   :  { %v223_v9 = vpop.xlane.xlu2 %222 }
 0x229   :  { %v229_v42 = vsub.f32 %v2194_v41, %v223_v9 }
 0x22b   :  { %v235_v43 = vmul.f32 1.442695, %v229_v42 }
 0x236   :  { %v385_v3 = vpop.xlane.xlu0 %384 }
 0x237   :  { %v395_v6 = vsub.f32 %v374_v45, %v385_v3 }
 0x239   :  { %v399_v8 = vmul.f32 1.442695, %v395_v6 }
 0x23b   :  { %1793 = vpow2.f32 %v399_v8 }
 0x23e   :  { %v388_v10 = vpop.xlane.xlu1 %387  ;;  %v217_v11 = vpop.xlane.xlu0 %216 }
 0x23f   :  { %v396_v12 = vsub.f32 %v376_v50, %v388_v10  ;;  %v227_v15 = vsub.f32 %v205_v47, %v217_v11 }
 0x241   :  { %v2210_v13 = vpop.eup %1793  ;;  %v401_v14 = vmul.f32 1.442695, %v396_v12  ;;  %v231_v18 = vmul.f32 1.442695, %v227_v15 }
 0x242   :  { %v407_v16 = vsel %vm214_vm2, %v2210_v13, 0.0 }
 0x243   :  { %1795 = vpow2.f32 %v401_v14  ;;  %408 = vadd.xlane.f32.xlu1 %v407_v16 }
 0x244   :  { %1797 = vpow2.f32 %v231_v18 }
 0x246   :  { %v391_v19 = vpop.xlane.xlu2 %390  ;;  %v220_v20 = vpop.xlane.xlu1 %219 }
 0x247   :  { %v397_v21 = vsub.f32 %v379_v58, %v391_v19  ;;  %v228_v22 = vsub.f32 %v207_v55, %v220_v20  ;;  %v226_v34 = vpop.xlane.xlu0 %225 }
 0x248   :  { %v230_v44 = vsub.f32 %v2201_v56, %v226_v34 }
 0x249   :  { %v2214_v23 = vpop.eup %1795  ;;  %v403_v24 = vmul.f32 1.442695, %v397_v21  ;;  %v233_v25 = vmul.f32 1.442695, %v228_v22 }
 0x24a   :  { %v410_v27 = vsel %vm214_vm2, %v2214_v23, 0.0  ;;  %v2218_v29 = vpop.eup %1797  ;;  %v237_v45 = vmul.f32 1.442695, %v230_v44 }
 0x24b   :  { %1799 = vpow2.f32 %v403_v24  ;;  %411 = vadd.xlane.f32.xlu2 %v410_v27  ;;  %v239_v36 = vsel %vm214_vm2, %v2218_v29, 0.0 }
 0x24c   :  { %1801 = vpow2.f32 %v233_v25 }
 0x24e   :  { %v394_v28 = vpop.xlane.xlu2 %393 }
 0x24f   :  { %v398_v30 = vsub.f32 %v381_v63, %v394_v28 }
 0x251   :  { %v2220_v31 = vpop.eup %1799  ;;  %v405_v32 = vmul.f32 1.442695, %v398_v30 }
 0x252   :  { %v2222_v33 = vpop.eup %1801  ;;  %v413_v35 = vsel %vm214_vm2, %v2220_v31, 0.0 }
 0x253   :  { %1803 = vpow2.f32 %v405_v32  ;;  %414 = vadd.xlane.f32.xlu1 %v413_v35  ;;  %v242_v37 = vsel %vm214_vm2, %v2222_v33, 0.0  ;;  %240 = vadd.xlane.f32.xlu2 %v239_v36 }
 0x254   :  { %243 = vadd.xlane.f32.xlu0 %v242_v37  ;;  %1805 = vpow2.f32 %v235_v43 }
 0x255   :  { %1807 = vpow2.f32 %v237_v45 }
 0x259   :  { %v2230_v38 = vpop.eup %1803 }
 0x25a   :  { %v484_v39 = vpop.permute.xlu0 %483  ;;  %v416_v40 = vsel %vm214_vm2, %v2230_v38, 0.0  ;;  %v2242_v46 = vpop.eup %1805 }
 0x25b   :  { %499 = vmatpush.bf16.msrb.mxu0 %v484_v39  ;;  %417 = vadd.xlane.f32.xlu2 %v416_v40  ;;  %v245_v47 = vsel %vm214_vm2, %v2242_v46, 0.0  ;;  %v2246_v48 = vpop.eup %1807 }
 0x268   :  { %313 = vrot.lane.b32.xlu0 %v2168_v17, %s2062_s22 }
 0x26c   :  { %481 = vrot.lane.b32.xlu1 %v2168_v17, %s2061_s21  ;;  %v248_v17 = vsel %vm214_vm2, %v2246_v48, 0.0 }
 0x273   :  { %315 = vrot.lane.b32.xlu2 %v2172_v26, %s2062_s22 }
 0x296   :  { %246 = vadd.xlane.f32.xlu1 %v245_v47 }
 0x29c   :  { %249 = vadd.xlane.f32.xlu2 %v248_v17 }
 0x2b6   :  { %v2250_v26 = vpop.xlane.xlu1 %408 }
 0x2b7   :  { %1809 = vrcp.f32 %v2250_v26  ;;  %vm424_vm3 = vweird.f32 %v2250_v26  ;;  %v428_v63 = vand.u32 2147483647, %v2250_v26  ;;  %v430_v3 = vand.u32 2147483648, %v2250_v26 }
 0x2b9   :  { %v431_v17 = vor.u32 1.1754944e-38, %v430_v3 }
 0x2bd   :  { %v2253_v49 = vpop.eup %1809 }
 0x2be   :  { %v412_v41 = vpop.xlane.xlu2 %411  ;;  %v420_v51 = vmul.f32 %v2253_v49, %v2250_v26  ;;  %vm425_vm4 = vweird.f32 %v2253_v49 }
 0x2bf   :  { %1811 = vrcp.f32 %v412_v41  ;;  %v443_v6 = vand.u32 2147483647, %v412_v41  ;;  %vm439_vm5 = vweird.f32 %v412_v41  ;;  %v445_v10 = vand.u32 2147483648, %v412_v41  ;;  %vm2281_vm8 = vmor %vm424_vm3, %vm425_vm4 }
 0x2c0   :  { %v421_v55 = vsub.f32 1.0, %v420_v51 }
 0x2c1   :  { %vm2285_vm9 = vcmp.eq.f32.partialorder %v443_v6, 8.507059e+37  ;;  %v446_v30 = vor.u32 1.1754944e-38, %v445_v10 }
 0x2c2   :  { %v422_v58 = vmul.f32 %v2253_v49, %v421_v55 }
 0x2c4   :  { %v423_v9 = vadd.f32 %v2253_v49, %v422_v58 }
 0x2c5   :  { %v2255_v50 = vpop.eup %1811 }
 0x2c6   :  { %v435_v52 = vmul.f32 %v2255_v50, %v412_v41  ;;  %v241_v53 = vpop.xlane.xlu2 %240  ;;  %v2260_v57 = vpop.xlane.xlu1 %414  ;;  %vm440_vm6 = vweird.f32 %v2255_v50  ;;  %v427_v40 = vsel %vm2281_vm8, %v2253_v49, %v423_v9 }
 0x2c7   :  { %v244_v54 = vpop.xlane.xlu0 %243  ;;  %1813 = vrcp.f32 %v241_v53  ;;  %v262_v14 = vand.u32 2147483648, %v241_v53  ;;  %v260_v18 = vand.u32 2147483647, %v241_v53  ;;  %vm2290_vm11 = vmor %vm439_vm5, %vm440_vm6  ;;  %vm256_vm12 = vweird.f32 %v241_v53 }
 0x2c8   :  { %1815 = vrcp.f32 %v244_v54  ;;  %v436_v56 = vsub.f32 1.0, %v435_v52  ;;  %v277_v19 = vand.u32 2147483648, %v244_v54  ;;  %v275_v25 = vand.u32 2147483647, %v244_v54 }
 0x2c9   :  { %1817 = vrcp.f32 %v2260_v57  ;;  %vm271_vm13 = vweird.f32 %v244_v54  ;;  %v263_v35 = vor.u32 1.1754944e-38, %v262_v14  ;;  %vm261_vm15 = vcmp.eq.f32.partialorder %v260_v18, 8.507059e+37 }
 0x2ca   :  { %v437_v60 = vmul.f32 %v2255_v50, %v436_v56  ;;  %v278_v42 = vor.u32 1.1754944e-38, %v277_v19  ;;  %vm276_vm4 = vcmp.eq.f32.partialorder %v275_v25, 8.507059e+37  ;;  %vm429_vm5 = vcmp.eq.f32.partialorder %v428_v63, 8.507059e+37 }
 0x2cb   :  { %v458_v3 = vand.u32 2147483647, %v2260_v57 }
 0x2cc   :  { %v438_v12 = vadd.f32 %v2255_v50, %v437_v60 }
 0x2cd   :  { %v1814_v59 = vpop.eup %1813 }
 0x2ce   :  { %v2265_v61 = vpop.xlane.xlu2 %417  ;;  %v1816_v62 = vpop.eup %1815  ;;  %v252_v0 = vmul.f32 %v1814_v59, %v241_v53  ;;  %vm257_vm7 = vweird.f32 %v1814_v59  ;;  %v442_v34 = vsel %vm2290_vm11, %v2255_v50, %v438_v12  ;;  %v432_v53 = vsel %vm429_vm5, %v431_v17, %v427_v40 }
 0x2cf   :  { %1819 = vrcp.f32 %v2265_v61  ;;  %v267_v8 = vmul.f32 %v1816_v62, %v244_v54  ;;  %v2275_v20 = vpop.eup %1817  ;;  %vm272_vm10 = vweird.f32 %v1816_v62  ;;  %vm258_vm14 = vmor %vm256_vm12, %vm257_vm7  ;;  %v447_v50 = vsel %vm2285_vm9, %v446_v30, %v442_v34 }
 0x2d0   :  { %v253_v11 = vsub.f32 1.0, %v252_v0  ;;  %vm273_vm3 = vmor %vm271_vm13, %vm272_vm10  ;;  %v450_v44 = vmul.f32 %v2275_v20, %v2260_v57  ;;  %v448_v56 = vmul.f32 %v2214_v23, %v447_v50  ;;  %vm455_vm7 = vweird.f32 %v2275_v20 }
 0x2d1   :  { %v268_v15 = vsub.f32 1.0, %v267_v8  ;;  %vm469_vm8 = vweird.f32 %v2265_v61  ;;  %v473_v23 = vand.u32 2147483647, %v2265_v61  ;;  %vm454_vm10 = vweird.f32 %v2260_v57 }
 0x2d2   :  { %v254_v16 = vmul.f32 %v1814_v59, %v253_v11  ;;  %v451_v54 = vsub.f32 1.0, %v450_v44  ;;  %vm456_vm11 = vmor %vm454_vm10, %vm455_vm7  ;;  %vm459_vm13 = vcmp.eq.f32.partialorder %v458_v3, 8.507059e+37  ;;  %vm535_vm10 = vcmask 64512  }
 0x2d3   :  { %v269_v24 = vmul.f32 %v1816_v62, %v268_v15  ;;  %vm474_vm12 = vcmp.eq.f32.partialorder %v473_v23, 8.507059e+37  ;;  %v534_v3 = vperm.slane %v2165_v7, 1 }
 0x2d4   :  { %v255_v32 = vadd.f32 %v1814_v59, %v254_v16  ;;  %v452_v60 = vmul.f32 %v2275_v20, %v451_v54 }
 0x2d5   :  { %v1820_v27 = vpop.eup %1819  ;;  %v270_v36 = vadd.f32 %v1816_v62, %v269_v24 }
 0x2d6   :  { %v465_v37 = vmul.f32 %v1820_v27, %v2265_v61  ;;  %v316_v39 = vpop.permute.xlu2 %315  ;;  %v259_v43 = vsel %vm258_vm14, %v1814_v59, %v255_v32  ;;  %vm470_vm6 = vweird.f32 %v1820_v27  ;;  %v453_v0 = vadd.f32 %v2275_v20, %v452_v60 }
 0x2d7   :  { %331 = vmatpush.bf16.msra.mxu2 %v316_v39  ;;  %v264_v45 = vsel %vm261_vm15, %v263_v35, %v259_v43  ;;  %v274_v47 = vsel %vm273_vm3, %v1816_v62, %v270_v36  ;;  %vm471_vm9 = vmor %vm469_vm8, %vm470_vm6 }
 0x2d8   :  { %v265_v26 = vmul.f32 %v2218_v29, %v264_v45  ;;  %v279_v41 = vsel %vm276_vm4, %v278_v42, %v274_v47  ;;  %v466_v49 = vsub.f32 1.0, %v465_v37  ;;  %v433_v29 = vmul.f32 %v2210_v13, %v432_v53 }
 0x2d9   :  { %v280_v52 = vmul.f32 %v2222_v33, %v279_v41  ;;  %v475_v33 = vand.u32 2147483648, %v2265_v61  ;;  %v460_v13 = vand.u32 2147483648, %v2260_v57  ;;  %v457_v9 = vsel %vm456_vm11, %v2275_v20, %v453_v0 }
 0x2da   :  { %v314_v51 = vpop.permute.xlu0 %313  ;;  %v467_v58 = vmul.f32 %v1820_v27, %v466_v49  ;;  %v479_v62 = vpack.c.bf16 %v448_v56, %v433_v29 }
 0x2db   :  { %332 = vmatpush.bf16.msra.mxu2 %v314_v51  ;;  %v311_v55 = vpack.c.bf16 %v280_v52, %v265_v26  ;;  %v476_v8 = vor.u32 1.1754944e-38, %v475_v33  ;;  %v461_v10 = vor.u32 1.1754944e-38, %v460_v13  ;;  %v121_v51 = vld [vmem:[#allocation2] sm:$0xf] }
 0x2dc   :  { %v468_v63 = vadd.f32 %v1820_v27, %v467_v58 }
 0x2dd   :  { %v462_v12 = vsel %vm459_vm13, %v461_v10, %v457_v9 }
 0x2de   :  { %v482_v59 = vpop.permute.xlu1 %481  ;;  %1679 = vmatmul.msk.bf16.vlgmr.msra.gmra.mxu2 %vm214_vm2, %v311_v55  ;;  %v472_v6 = vsel %vm471_vm9, %v1820_v27, %v468_v63  ;;  %v463_v61 = vmul.f32 %v2220_v31, %v462_v12  ;;  %vm542_vm9 = vcmask 1043456  }
 0x2df   :  { %500 = vmatpush.bf16.msrb.mxu0 %v482_v59  ;;  %v477_v11 = vsel %vm474_vm12, %v476_v8, %v472_v6  ;;  %v544_v52 = vsel %vm542_vm9, %v121_v51, 0 }
 0x2e0   :  { %v478_v14 = vmul.f32 %v2230_v38, %v477_v11  ;;  %553 = vmatpush.bf16.msrb.mxu2 %v544_v52 }
 0x2e2   :  { %1683 = vmatmul.msk.bf16.vlgmr.msrb.gmra.mxu0 %vm214_vm2, %v479_v62  ;;  %v480_v15 = vpack.c.bf16 %v478_v14, %v463_v61 }
 0x2f2   :  { %1684 = vmatmul.msk.bf16.gmra.mxu0 %vm214_vm2, %v480_v15 }
 0x309   :  { %v247_v16 = vpop.xlane.xlu1 %246 }
 0x30a   :  { %1821 = vrcp.f32 %v247_v16  ;;  %v292_v27 = vand.u32 2147483648, %v247_v16  ;;  %vm286_vm15 = vweird.f32 %v247_v16  ;;  %v290_v38 = vand.u32 2147483647, %v247_v16 }
 0x30c   :  { %v293_v35 = vor.u32 1.1754944e-38, %v292_v27  ;;  %vm291_vm5 = vcmp.eq.f32.partialorder %v290_v38, 8.507059e+37 }
 0x30f   :  { %v250_v57 = vpop.xlane.xlu2 %249 }
 0x310   :  { %v1822_v18 = vpop.eup %1821  ;;  %1823 = vrcp.f32 %v250_v57  ;;  %v307_v31 = vand.u32 2147483648, %v250_v57  ;;  %v305_v32 = vand.u32 2147483647, %v250_v57  ;;  %vm301_vm6 = vweird.f32 %v250_v57 }
 0x311   :  { %v282_v19 = vmul.f32 %v1822_v18, %v247_v16  ;;  %vm287_vm14 = vweird.f32 %v1822_v18 }
 0x312   :  { %vm288_vm3 = vmor %vm286_vm15, %vm287_vm14  ;;  %v308_v37 = vor.u32 1.1754944e-38, %v307_v31  ;;  %vm306_vm8 = vcmp.eq.f32.partialorder %v305_v32, 8.507059e+37 }
 0x313   :  { %v283_v21 = vsub.f32 1.0, %v282_v19 }
 0x315   :  { %v284_v22 = vmul.f32 %v1822_v18, %v283_v21 }
 0x316   :  { %v1824_v20 = vpop.eup %1823 }
 0x317   :  { %v285_v24 = vadd.f32 %v1822_v18, %v284_v22  ;;  %v297_v25 = vmul.f32 %v1824_v20, %v250_v57  ;;  %vm302_vm4 = vweird.f32 %v1824_v20 }
 0x318   :  { %vm303_vm7 = vmor %vm301_vm6, %vm302_vm4 }
 0x319   :  { %v298_v28 = vsub.f32 1.0, %v297_v25  ;;  %v289_v34 = vsel %vm288_vm3, %v1822_v18, %v285_v24 }
 0x31a   :  { %v294_v39 = vsel %vm291_vm5, %v293_v35, %v289_v34 }
 0x31b   :  { %v299_v30 = vmul.f32 %v1824_v20, %v298_v28  ;;  %v295_v43 = vmul.f32 %v2242_v46, %v294_v39 }
 0x31d   :  { %v300_v36 = vadd.f32 %v1824_v20, %v299_v30 }
 0x31f   :  { %v304_v40 = vsel %vm303_vm7, %v1824_v20, %v300_v36  ;;  %v2063_v20 = vmov 16.0  }
 0x320   :  { %v309_v42 = vsel %vm306_vm8, %v308_v37, %v304_v40  ;;  %1825 = vrcp.f32 %v2063_v20 }
 0x321   :  { %v310_v44 = vmul.f32 %v2246_v48, %v309_v42 }
 0x323   :  { %v312_v45 = vpack.c.bf16 %v310_v44, %v295_v43 }
 0x325   :  { %1680 = vmatmul.msk.bf16.gmra.mxu2 %vm214_vm2, %v312_v45 }
 0x35f   :  { %v502_v47 = vpop.f32.mrf.mxu0 }
 0x361   :  { %v334_v46 = vpop.f32.mrf.mxu2 }
 0x367   :  { %v504_v17 = vpop.f32.mrf.mxu0 }
 0x368   :  { %v1773_v26 = vpack.i.bf16 %v504_v17, %v502_v47 }
 0x369   :  { %v336_v48 = vpop.f32.mrf.mxu2 }
 0x36a   :  { %1774 = vrot.lane.b32.xlu1 %v1773_v26, %s2051_s11 }
 0x36f   :  { %v507_v41 = vpop.f32.mrf.mxu0 }
 0x377   :  { %v509_v50 = vpop.f32.mrf.mxu0 }
 0x378   :  { %v1778_v49 = vpack.i.bf16 %v509_v50, %v507_v41 }
 0x37a   :  { %1779 = vrot.lane.b32.xlu0 %v1778_v49, %s2051_s11 }
 0x3a8   :  { %v339_v29 = vpop.f32.mrf.mxu2 }
 0x3b0   :  { %v341_v33 = vpop.f32.mrf.mxu2 }
 0x3dc   :  { %v1775_v53 = vpop.permute.xlu1 %1774 }
 0x3dd   :  { %v1777_v54 = vunpack.i.h.bf16 %v1775_v53  ;;  %v1776_v55 = vunpack.i.l.bf16 %v1775_v53 }
 0x3df   :  { %v528_v56 = vsel %vm182_vm1, %v334_v46, %v1776_v55  ;;  %v529_v58 = vsel %vm182_vm1, %v336_v48, %v1777_v54  ;;  %v1750_v46 = vld [vmem:[#allocation5] sm:$0xff] }
 0x3e0   :  { %v532_v59 = vpack.c.bf16 %v529_v58, %v528_v56  ;;  %696 = vmatpush.bf16.msrb.mxu1 %v1750_v46 }
 0x3e2   :  { %1685 = vmatmul.msk.bf16.vlgmr.msrb.gmra.mxu2 %vm535_vm10, %v532_v59 }
 0x3ec   :  { %v1780_v60 = vpop.permute.xlu0 %1779 }
 0x3ed   :  { %v1782_v62 = vunpack.i.h.bf16 %v1780_v60  ;;  %v1781_v63 = vunpack.i.l.bf16 %v1780_v60 }
 0x3ef   :  { %v530_v0 = vsel %vm182_vm1, %v339_v29, %v1781_v63  ;;  %v531_v23 = vsel %vm182_vm1, %v341_v33, %v1782_v62 }
 0x3f0   :  { %v533_v13 = vpack.c.bf16 %v531_v23, %v530_v0 }
 0x3f2   :  { %1686 = vmatmul.msk.bf16.gmra.mxu2 %vm535_vm10, %v533_v13 }
 0x465   :  { %v555_v6 = vpop.f32.mrf.mxu2 }
 0x466   :  { %v556_v8 = vadd.f32 %v555_v6, %v534_v3 }
 0x468   :  { %v565_v9 = vadd.f32 %v556_v8, %v2142_v1 }
 0x46a   :  { %v569_v10 = vsel %vm138_vm0, %v565_v9, 0.0 }
 0x46b   :  { %570 = vadd.xlane.f32.xlu2 %v569_v10 }
 0x46d   :  { %v557_v11 = vpop.f32.mrf.mxu2 }
 0x46e   :  { %v558_v12 = vadd.f32 %v557_v11, %v534_v3 }
 0x470   :  { %v566_v14 = vadd.f32 %v558_v12, %v2147_v2  ;;  %v1826_v2 = vpop.eup %1825 }
 0x471   :  { %v582_v24 = vmul.f32 16.0, %v1826_v2  ;;  %vm586_vm11 = vweird.f32 %v1826_v2 }
 0x472   :  { %v572_v61 = vsel %vm138_vm0, %v566_v14, 0.0 }
 0x473   :  { %573 = vadd.xlane.f32.xlu0 %v572_v61  ;;  %v583_v25 = vsub.f32 1.0, %v582_v24  ;;  %v664_v61 = vperm.slane %v2165_v7, 2 }
 0x475   :  { %v560_v15 = vpop.f32.mrf.mxu2  ;;  %v584_v27 = vmul.f32 %v1826_v2, %v583_v25 }
 0x476   :  { %v561_v16 = vadd.f32 %v560_v15, %v534_v3 }
 0x477   :  { %v585_v38 = vadd.f32 %v1826_v2, %v584_v27 }
 0x478   :  { %v567_v57 = vadd.f32 %v561_v16, %v2155_v4 }
 0x479   :  { %v2347_v28 = vsel %vm586_vm11, %v1826_v2, %v585_v38 }
 0x47a   :  { %v575_v18 = vsel %vm138_vm0, %v567_v57, 0.0 }
 0x47b   :  { %576 = vadd.xlane.f32.xlu2 %v575_v18 }
 0x47d   :  { %v562_v19 = vpop.f32.mrf.mxu2 }
 0x47e   :  { %v563_v21 = vadd.f32 %v562_v19, %v534_v3 }
 0x480   :  { %v568_v1 = vadd.f32 %v563_v21, %v2160_v5 }
 0x482   :  { %v578_v22 = vsel %vm138_vm0, %v568_v1, 0.0 }
 0x483   :  { %579 = vadd.xlane.f32.xlu1 %v578_v22 }
 0x4de   :  { %v571_v4 = vpop.xlane.xlu2 %570 }
 0x4df   :  { %v588_v31 = vmul.f32 %v2347_v28, %v571_v4 }
 0x4e1   :  { %v592_v30 = vsub.f32 %v565_v9, %v588_v31 }
 0x4e3   :  { %v596_v32 = vmul.f32 %v592_v30, %v592_v30 }
 0x4e5   :  { %v600_v5 = vsel %vm138_vm0, %v596_v32, 0.0 }
 0x4e6   :  { %v574_v34 = vpop.xlane.xlu0 %573  ;;  %601 = vadd.xlane.f32.xlu2 %v600_v5 }
 0x4e7   :  { %v589_v35 = vmul.f32 %v2347_v28, %v574_v34 }
 0x4e9   :  { %v593_v36 = vsub.f32 %v566_v14, %v589_v35 }
 0x4eb   :  { %v597_v37 = vmul.f32 %v593_v36, %v593_v36 }
 0x4ed   :  { %v603_v39 = vsel %vm138_vm0, %v597_v37, 0.0 }
 0x4ee   :  { %604 = vadd.xlane.f32.xlu2 %v603_v39  ;;  %v577_v40 = vpop.xlane.xlu2 %576 }
 0x4ef   :  { %v590_v42 = vmul.f32 %v2347_v28, %v577_v40 }
 0x4f1   :  { %v2354_v43 = vsub.f32 %v567_v57, %v590_v42 }
 0x4f3   :  { %v598_v44 = vmul.f32 %v2354_v43, %v2354_v43 }
 0x4f5   :  { %v606_v45 = vsel %vm138_vm0, %v598_v44, 0.0 }
 0x4f6   :  { %v580_v47 = vpop.xlane.xlu1 %579  ;;  %607 = vadd.xlane.f32.xlu2 %v606_v45 }
 0x4f7   :  { %v591_v17 = vmul.f32 %v2347_v28, %v580_v47 }
 0x4f9   :  { %v2360_v26 = vsub.f32 %v568_v1, %v591_v17  ;;  %v669_v1 = vperm.slane %v2165_v7, 3  ;;  %v1752_v17 = vld [vmem:[%s2648_s4 + $0x8] sm:$0xff] }
 0x4fa   :  { %739 = vmatpush.bf16.msrb.mxu3 %v1752_v17 }
 0x4fb   :  { %v599_v41 = vmul.f32 %v2360_v26, %v2360_v26 }
 0x4fd   :  { %v609_v50 = vsel %vm138_vm0, %v599_v41, 0.0 }
 0x4fe   :  { %610 = vadd.xlane.f32.xlu2 %v609_v50 }
 0x559   :  { %v602_v49 = vpop.xlane.xlu2 %601 }
 0x55a   :  { %v612_v51 = vmul.f32 %v602_v49, %v2347_v28 }
 0x55c   :  { %v616_v52 = vadd.f32 1e-05, %v612_v51 }
 0x55e   :  { %1827 = vrsqrt.f32 %v616_v52  ;;  %vm626_vm13 = vweird.f32 %v616_v52 }
 0x561   :  { %v605_v48 = vpop.xlane.xlu2 %604 }
 0x562   :  { %v613_v53 = vmul.f32 %v605_v48, %v2347_v28 }
 0x564   :  { %v1828_v54 = vpop.eup %1827  ;;  %v617_v55 = vadd.f32 1e-05, %v613_v53 }
 0x565   :  { %v621_v56 = vmul.f32 %v1828_v54, %v616_v52  ;;  %vm627_vm12 = vweird.f32 %v1828_v54 }
 0x566   :  { %1829 = vrsqrt.f32 %v617_v55  ;;  %vm628_vm14 = vmor %vm626_vm13, %vm627_vm12  ;;  %vm636_vm3 = vweird.f32 %v617_v55 }
 0x567   :  { %v622_v58 = vmul.f32 %v1828_v54, %v621_v56 }
 0x569   :  { %v623_v59 = vmul.f32 0.5, %v622_v58  ;;  %v608_v29 = vpop.xlane.xlu2 %607 }
 0x56a   :  { %v614_v60 = vmul.f32 %v608_v29, %v2347_v28 }
 0x56b   :  { %v624_v62 = vsub.f32 1.5, %v623_v59 }
 0x56c   :  { %v1830_v63 = vpop.eup %1829  ;;  %v618_v33 = vadd.f32 1e-05, %v614_v60  ;;  %v714_v60 = vperm.slane %v2165_v7, 5 }
 0x56d   :  { %v625_v0 = vmul.f32 %v1828_v54, %v624_v62  ;;  %v631_v23 = vmul.f32 %v1830_v63, %v617_v55  ;;  %vm637_vm15 = vweird.f32 %v1830_v63 }
 0x56e   :  { %1831 = vrsqrt.f32 %v618_v33  ;;  %vm638_vm4 = vmor %vm636_vm3, %vm637_vm15  ;;  %vm646_vm6 = vweird.f32 %v618_v33 }
 0x56f   :  { %v632_v13 = vmul.f32 %v1830_v63, %v631_v23  ;;  %v629_v3 = vsel %vm628_vm14, %v1828_v54, %v625_v0 }
 0x570   :  { %v660_v12 = vmul.f32 %v629_v3, %v592_v30 }
 0x571   :  { %v633_v6 = vmul.f32 0.5, %v632_v13  ;;  %v611_v8 = vpop.xlane.xlu2 %610 }
 0x572   :  { %v615_v9 = vmul.f32 %v611_v8, %v2347_v28  ;;  %v665_v21 = vmul.f32 %v664_v61, %v660_v12 }
 0x573   :  { %v634_v10 = vsub.f32 1.5, %v633_v6 }
 0x574   :  { %v1832_v11 = vpop.eup %1831  ;;  %v619_v14 = vadd.f32 1e-05, %v615_v9  ;;  %v670_v25 = vadd.f32 %v669_v1, %v665_v21 }
 0x575   :  { %v635_v15 = vmul.f32 %v1830_v63, %v634_v10  ;;  %v641_v16 = vmul.f32 %v1832_v11, %v618_v33  ;;  %vm647_vm5 = vweird.f32 %v1832_v11 }
 0x576   :  { %1833 = vrsqrt.f32 %v619_v14  ;;  %vm648_vm7 = vmor %vm646_vm6, %vm647_vm5  ;;  %vm656_vm11 = vweird.f32 %v619_v14 }
 0x577   :  { %v639_v57 = vsel %vm638_vm4, %v1830_v63, %v635_v15  ;;  %v642_v18 = vmul.f32 %v1832_v11, %v641_v16 }
 0x578   :  { %v661_v19 = vmul.f32 %v639_v57, %v593_v36 }
 0x579   :  { %v643_v22 = vmul.f32 0.5, %v642_v18 }
 0x57a   :  { %v666_v20 = vmul.f32 %v664_v61, %v661_v19 }
 0x57b   :  { %v644_v2 = vsub.f32 1.5, %v643_v22 }
 0x57c   :  { %v1834_v24 = vpop.eup %1833  ;;  %v671_v27 = vadd.f32 %v669_v1, %v666_v20 }
 0x57d   :  { %v645_v38 = vmul.f32 %v1832_v11, %v644_v2  ;;  %v651_v4 = vmul.f32 %v1834_v24, %v619_v14  ;;  %vm657_vm8 = vweird.f32 %v1834_v24 }
 0x57e   :  { %v674_v31 = vpack.c.bf16 %v671_v27, %v670_v25  ;;  %vm658_vm12 = vmor %vm656_vm11, %vm657_vm8 }
 0x57f   :  { %v652_v30 = vmul.f32 %v1834_v24, %v651_v4  ;;  %v649_v32 = vsel %vm648_vm7, %v1832_v11, %v645_v38 }
 0x580   :  { %1691 = vmatmul.msk.bf16.vlgmr.msrb.gmra.mxu1 %vm138_vm0, %v674_v31  ;;  %v662_v35 = vmul.f32 %v649_v32, %v2354_v43  ;;  %v1751_v43 = vld [vmem:[%s2648_s4] sm:$0xff] }
 0x581   :  { %v653_v5 = vmul.f32 0.5, %v652_v30  ;;  %740 = vmatpush.bf16.msrb.mxu3 %v1751_v43 }
 0x582   :  { %v667_v40 = vmul.f32 %v664_v61, %v662_v35 }
 0x583   :  { %v654_v34 = vsub.f32 1.5, %v653_v5 }
 0x584   :  { %v672_v44 = vadd.f32 %v669_v1, %v667_v40 }
 0x585   :  { %v655_v36 = vmul.f32 %v1834_v24, %v654_v34 }
 0x587   :  { %v659_v37 = vsel %vm658_vm12, %v1834_v24, %v655_v36 }
 0x588   :  { %v663_v39 = vmul.f32 %v659_v37, %v2360_v26  ;;  %v676_v26 = vperm.slane %v2165_v7, 4 }
 0x58a   :  { %v668_v42 = vmul.f32 %v664_v61, %v663_v39 }
 0x58c   :  { %v673_v45 = vadd.f32 %v669_v1, %v668_v42 }
 0x58e   :  { %v675_v47 = vpack.c.bf16 %v673_v45, %v672_v44 }
 0x590   :  { %1692 = vmatmul.msk.bf16.gmra.mxu1 %vm138_vm0, %v675_v47 }
 0x5fd   :  { %v698_v41 = vpop.f32.mrf.mxu1 }
 0x5fe   :  { %v699_v50 = vadd.f32 %v698_v41, %v676_v26 }
 0x600   :  { %v708_v52 = vmax.f32 %v699_v50, 0.0 }
 0x605   :  { %v700_v49 = vpop.f32.mrf.mxu1 }
 0x606   :  { %v701_v51 = vadd.f32 %v700_v49, %v676_v26 }
 0x608   :  { %v709_v46 = vmax.f32 %v701_v51, 0.0 }
 0x60a   :  { %v712_v48 = vpack.c.bf16 %v709_v46, %v708_v52 }
 0x60c   :  { %1701 = vmatmul.msk.bf16.vlgmr.msrb.gmra.mxu3 %vm214_vm2, %v712_v48 }
 0x60d   :  { %v703_v53 = vpop.f32.mrf.mxu1 }
 0x60e   :  { %v704_v54 = vadd.f32 %v703_v53, %v676_v26 }
 0x610   :  { %v710_v58 = vmax.f32 %v704_v54, 0.0 }
 0x615   :  { %v705_v55 = vpop.f32.mrf.mxu1 }
 0x616   :  { %v706_v56 = vadd.f32 %v705_v55, %v676_v26 }
 0x618   :  { %v711_v59 = vmax.f32 %v706_v56, 0.0 }
 0x61a   :  { %v713_v29 = vpack.c.bf16 %v711_v59, %v710_v58 }
 0x61c   :  { %1702 = vmatmul.msk.bf16.gmra.mxu3 %vm214_vm2, %v713_v29 }
 0x68f   :  { %v742_v62 = vpop.f32.mrf.mxu3 }
 0x690   :  { %v743_v63 = vadd.f32 %v742_v62, %v714_v60 }
 0x692   :  { %v752_v33 = vadd.f32 %v743_v63, %v670_v25 }
 0x694   :  { %v756_v0 = vsel %vm138_vm0, %v752_v33, 0.0 }
 0x695   :  { %757 = vadd.xlane.f32.xlu2 %v756_v0  ;;  %v1891_v0 = vld [vmem:[#allocation7] sm:$0xff] }
 0x697   :  { %v744_v23 = vpop.f32.mrf.mxu3 }
 0x698   :  { %v745_v13 = vadd.f32 %v744_v23, %v714_v60  ;;  %v844_v23 = vperm.slane %v1891_v0, 6 }
 0x69a   :  { %v753_v3 = vadd.f32 %v745_v13, %v671_v27 }
 0x69c   :  { %v759_v6 = vsel %vm138_vm0, %v753_v3, 0.0 }
 0x69d   :  { %760 = vadd.xlane.f32.xlu0 %v759_v6 }
 0x69f   :  { %v747_v8 = vpop.f32.mrf.mxu3 }
 0x6a0   :  { %v748_v9 = vadd.f32 %v747_v8, %v714_v60  ;;  %v849_v8 = vperm.slane %v1891_v0, 7 }
 0x6a2   :  { %v754_v10 = vadd.f32 %v748_v9, %v672_v44 }
 0x6a4   :  { %v762_v11 = vsel %vm138_vm0, %v754_v10, 0.0 }
 0x6a5   :  { %763 = vadd.xlane.f32.xlu1 %v762_v11 }
 0x6a7   :  { %v749_v12 = vpop.f32.mrf.mxu3 }
 0x6a8   :  { %v750_v7 = vadd.f32 %v749_v12, %v714_v60 }
 0x6aa   :  { %v755_v14 = vadd.f32 %v750_v7, %v673_v45 }
 0x6ac   :  { %v765_v61 = vsel %vm138_vm0, %v755_v14, 0.0 }
 0x6ad   :  { %766 = vadd.xlane.f32.xlu0 %v765_v61 }
 0x708   :  { %v758_v15 = vpop.xlane.xlu2 %757 }
 0x709   :  { %v768_v16 = vmul.f32 %v758_v15, %v2347_v28 }
 0x70b   :  { %v772_v57 = vsub.f32 %v752_v33, %v768_v16 }
 0x70d   :  { %v776_v18 = vmul.f32 %v772_v57, %v772_v57 }
 0x70f   :  { %v780_v19 = vsel %vm138_vm0, %v776_v18, 0.0 }
 0x710   :  { %v761_v21 = vpop.xlane.xlu0 %760  ;;  %781 = vadd.xlane.f32.xlu0 %v780_v19 }
 0x711   :  { %v769_v1 = vmul.f32 %v761_v21, %v2347_v28 }
 0x713   :  { %v773_v22 = vsub.f32 %v753_v3, %v769_v1 }
 0x715   :  { %v777_v20 = vmul.f32 %v773_v22, %v773_v22 }
 0x717   :  { %v783_v2 = vsel %vm138_vm0, %v777_v20, 0.0 }
 0x718   :  { %784 = vadd.xlane.f32.xlu2 %v783_v2  ;;  %v764_v24 = vpop.xlane.xlu1 %763 }
 0x719   :  { %v770_v25 = vmul.f32 %v764_v24, %v2347_v28  ;;  %v114_v24 = vld [vmem:[#allocation10 + $0x8] sm:$0xff] }
 0x71b   :  { %v2394_v27 = vsub.f32 %v754_v10, %v770_v25 }
 0x71d   :  { %v778_v38 = vmul.f32 %v2394_v27, %v2394_v27 }
 0x71f   :  { %v786_v4 = vsel %vm138_vm0, %v778_v38, 0.0 }
 0x720   :  { %v767_v31 = vpop.xlane.xlu0 %766  ;;  %787 = vadd.xlane.f32.xlu2 %v786_v4 }
 0x721   :  { %v771_v30 = vmul.f32 %v767_v31, %v2347_v28 }
 0x723   :  { %v2400_v32 = vsub.f32 %v755_v14, %v771_v30 }
 0x725   :  { %v779_v5 = vmul.f32 %v2400_v32, %v2400_v32 }
 0x727   :  { %v789_v34 = vsel %vm138_vm0, %v779_v5, 0.0 }
 0x728   :  { %790 = vadd.xlane.f32.xlu1 %v789_v34 }
 0x783   :  { %v782_v35 = vpop.xlane.xlu0 %781 }
 0x784   :  { %v792_v36 = vmul.f32 %v782_v35, %v2347_v28 }
 0x786   :  { %v796_v37 = vadd.f32 1e-05, %v792_v36  ;;  %v2436_v36 = vld [vmem:[#allocation7 + $0x8] sm:$0xff] }
 0x788   :  { %1835 = vrsqrt.f32 %v796_v37  ;;  %vm806_vm14 = vweird.f32 %v796_v37 }
 0x78b   :  { %v785_v39 = vpop.xlane.xlu2 %784 }
 0x78c   :  { %v793_v40 = vmul.f32 %v785_v39, %v2347_v28  ;;  %v935_v39 = vperm.slane %v2436_v36, 0 }
 0x78e   :  { %v1836_v42 = vpop.eup %1835  ;;  %v797_v44 = vadd.f32 1e-05, %v793_v40 }
 0x78f   :  { %v801_v45 = vmul.f32 %v1836_v42, %v796_v37  ;;  %vm807_vm13 = vweird.f32 %v1836_v42 }
 0x790   :  { %1837 = vrsqrt.f32 %v797_v44  ;;  %vm808_vm3 = vmor %vm806_vm14, %vm807_vm13  ;;  %vm816_vm4 = vweird.f32 %v797_v44 }
 0x791   :  { %v802_v47 = vmul.f32 %v1836_v42, %v801_v45 }
 0x793   :  { %v803_v17 = vmul.f32 0.5, %v802_v47  ;;  %v788_v43 = vpop.xlane.xlu2 %787 }
 0x794   :  { %v794_v41 = vmul.f32 %v788_v43, %v2347_v28 }
 0x795   :  { %v804_v49 = vsub.f32 1.5, %v803_v17 }
 0x796   :  { %v1838_v26 = vpop.eup %1837  ;;  %v798_v50 = vadd.f32 1e-05, %v794_v41 }
 0x797   :  { %v811_v51 = vmul.f32 %v1838_v26, %v797_v44  ;;  %v805_v46 = vmul.f32 %v1836_v42, %v804_v49  ;;  %vm817_vm15 = vweird.f32 %v1838_v26 }
 0x798   :  { %1839 = vrsqrt.f32 %v798_v50  ;;  %vm818_vm5 = vmor %vm816_vm4, %vm817_vm15  ;;  %vm826_vm7 = vweird.f32 %v798_v50 }
 0x799   :  { %v812_v52 = vmul.f32 %v1838_v26, %v811_v51  ;;  %v809_v59 = vsel %vm808_vm3, %v1836_v42, %v805_v46 }
 0x79a   :  { %v840_v33 = vmul.f32 %v809_v59, %v772_v57  ;;  %v113_v57 = vld [vmem:[#allocation10] sm:$0xff] }
 0x79b   :  { %v813_v48 = vmul.f32 0.5, %v812_v52  ;;  %v791_v53 = vpop.xlane.xlu1 %790 }
 0x79c   :  { %v795_v54 = vmul.f32 %v791_v53, %v2347_v28  ;;  %v845_v11 = vmul.f32 %v844_v23, %v840_v33 }
 0x79d   :  { %v814_v55 = vsub.f32 1.5, %v813_v48 }
 0x79e   :  { %v1840_v56 = vpop.eup %1839  ;;  %v799_v58 = vadd.f32 1e-05, %v795_v54  ;;  %v850_v61 = vadd.f32 %v849_v8, %v845_v11 }
 0x79f   :  { %v815_v29 = vmul.f32 %v1838_v26, %v814_v55  ;;  %v821_v60 = vmul.f32 %v1840_v56, %v798_v50  ;;  %vm827_vm6 = vweird.f32 %v1840_v56 }
 0x7a0   :  { %1841 = vrsqrt.f32 %v799_v58  ;;  %vm828_vm11 = vmor %vm826_vm7, %vm827_vm6  ;;  %vm836_vm12 = vweird.f32 %v799_v58 }
 0x7a1   :  { %v819_v62 = vsel %vm818_vm5, %v1838_v26, %v815_v29  ;;  %v822_v63 = vmul.f32 %v1840_v56, %v821_v60 }
 0x7a2   :  { %v841_v13 = vmul.f32 %v819_v62, %v773_v22 }
 0x7a3   :  { %v823_v3 = vmul.f32 0.5, %v822_v63  ;;  %v922_v63 = vld [vmem:[#allocation2 + $0x4] sm:$0xf] }
 0x7a4   :  { %v846_v6 = vmul.f32 %v844_v23, %v841_v13  ;;  %v1343_v33 = vsel %vm542_vm9, %v922_v63, 0 }
 0x7a5   :  { %v824_v12 = vsub.f32 1.5, %v823_v3 }
 0x7a6   :  { %v1842_v9 = vpop.eup %1841  ;;  %v851_v10 = vadd.f32 %v849_v8, %v846_v6  ;;  %v1892_v6 = vld [vmem:[#allocation8] sm:$0xff] }
 0x7a7   :  { %v831_v7 = vmul.f32 %v1842_v9, %v799_v58  ;;  %v825_v15 = vmul.f32 %v1840_v56, %v824_v12  ;;  %vm837_vm8 = vweird.f32 %v1842_v9  ;;  %v1893_v12 = vld [vmem:[#allocation8 + $0x8] sm:$0xff] }
 0x7a8   :  { %1703 = vmatpush.xpose.msk.msra.mxu0 %vm138_vm0, %v851_v10  ;;  %vm838_vm13 = vmor %vm836_vm12, %vm837_vm8 }
 0x7a9   :  { %v832_v14 = vmul.f32 %v1842_v9, %v831_v7  ;;  %v829_v19 = vsel %vm828_vm11, %v1840_v56, %v825_v15 }
 0x7aa   :  { %v842_v22 = vmul.f32 %v829_v19, %v2394_v27  ;;  %v1753_v27 = vld [vmem:[%s2645_s1 + $0x8] sm:$0xff] }
 0x7ab   :  { %v833_v16 = vmul.f32 0.5, %v832_v14  ;;  %955 = vmatpush.bf16.msra.mxu1 %v1753_v27 }
 0x7ac   :  { %1704 = vmatpush.xpose.msk.msra.mxu0 %vm138_vm0, %v850_v61  ;;  %v847_v38 = vmul.f32 %v844_v23, %v842_v22 }
 0x7ad   :  { %v834_v18 = vsub.f32 1.5, %v833_v16 }
 0x7ae   :  { %v852_v4 = vadd.f32 %v849_v8, %v847_v38 }
 0x7af   :  { %v835_v21 = vmul.f32 %v1842_v9, %v834_v18  ;;  %1705 = vmatmul.msk.f32.vlgmr.msra.gmra.mxu0 %vm138_vm0, %v113_v57  ;;  %v1894_v18 = vld [vmem:[#allocation8 + $0x10] sm:$0xff] }
 0x7b1   :  { %v839_v1 = vsel %vm838_vm13, %v1842_v9, %v835_v21 }
 0x7b2   :  { %v843_v20 = vmul.f32 %v839_v1, %v2400_v32 }
 0x7b4   :  { %v848_v2 = vmul.f32 %v844_v23, %v843_v20 }
 0x7b6   :  { %v853_v25 = vadd.f32 %v849_v8, %v848_v2 }
 0x7b7   :  { %1706 = vmatmul.msk.f32.gmra.mxu0 %vm138_vm0, %v114_v24 }
 0x7b8   :  { %1707 = vmatpush.xpose.msk.msra.mxu2 %vm138_vm0, %v853_v25 }
 0x7bc   :  { %1708 = vmatpush.xpose.msk.msra.mxu2 %vm138_vm0, %v852_v4 }
 0x7bf   :  { %1709 = vmatmul.msk.f32.vlgmr.msra.gmra.mxu2 %vm138_vm0, %v113_v57 }
 0x7c7   :  { %1710 = vmatmul.msk.f32.gmra.mxu2 %vm138_vm0, %v114_v24  ;;  %v1895_v24 = vld [vmem:[#allocation8 + $0x18] sm:$0xff] }
 0x82c   :  { %v2422_v31 = vpop.f32.mrf.mxu0 }
 0x834   :  { %v2424_v30 = vpop.f32.mrf.mxu0 }
 0x835   :  { %v933_v32 = vpack.c.bf16 %v2424_v30, %v2422_v31 }
 0x837   :  { %1721 = vmatmul.msk.bf16.vlgmr.msra.gmra.mxu1 %vm138_vm0, %v933_v32 }
 0x842   :  { %v2429_v5 = vpop.f32.mrf.mxu2 }
 0x84a   :  { %v2431_v34 = vpop.f32.mrf.mxu2 }
 0x84b   :  { %v934_v35 = vpack.c.bf16 %v2431_v34, %v2429_v5 }
 0x84d   :  { %1722 = vmatmul.msk.bf16.gmra.mxu1 %vm138_vm0, %v934_v35 }
 0x8b4   :  { %v957_v37 = vpop.f32.mrf.mxu1 }
 0x8b5   :  { %v958_v40 = vadd.f32 %v957_v37, %v935_v39 }
 0x8b7   :  { %v967_v44 = vpack.c.bf16 %v958_v40, %v958_v40 }
 0x8b9   :  { %v975_v17 = vunpack.c.l.b16 %v967_v44 }
 0x8bc   :  { %v959_v42 = vpop.f32.mrf.mxu1 }
 0x8bd   :  { %v960_v45 = vadd.f32 %v959_v42, %v935_v39 }
 0x8bf   :  { %v968_v47 = vpack.c.bf16 %v960_v45, %v960_v45 }
 0x8c1   :  { %v976_v43 = vunpack.c.l.b16 %v968_v47 }
 0x8c3   :  { %v2439_v41 = vpack.c.b16 %v976_v43, %v975_v17 }
 0x8c5   :  { %1145 = vrot.lane.b32.xlu2 %v2439_v41, %s2058_s0  ;;  %1149 = vrot.lane.b32.xlu1 %v2439_v41, %s2060_s19 }
 0x8ca   :  { %v962_v26 = vpop.f32.mrf.mxu1 }
 0x8cb   :  { %v963_v50 = vadd.f32 %v962_v26, %v935_v39 }
 0x8cd   :  { %v969_v51 = vpack.c.bf16 %v963_v50, %v963_v50 }
 0x8cf   :  { %v977_v48 = vunpack.c.l.b16 %v969_v51 }
 0x8d2   :  { %v964_v49 = vpop.f32.mrf.mxu1 }
 0x8d3   :  { %v965_v52 = vadd.f32 %v964_v49, %v935_v39 }
 0x8d5   :  { %v970_v46 = vpack.c.bf16 %v965_v52, %v965_v52 }
 0x8d7   :  { %v978_v53 = vunpack.c.l.b16 %v970_v46 }
 0x8d9   :  { %v2445_v54 = vpack.c.b16 %v978_v53, %v977_v48 }
 0x8db   :  { %1151 = vrot.lane.b32.xlu0 %v2445_v54, %s2060_s19  ;;  %983 = vrot.lane.b32.xlu1 %v2445_v54, %s2059_s18 }
 0x8e3   :  { %1147 = vrot.lane.b32.xlu0 %v2445_v54, %s2058_s0 }
 0x8eb   :  { %981 = vrot.lane.b32.xlu0 %v2439_v41, %s2059_s18 }
 0x91f   :  { %v1146_v0 = vpop.permute.xlu2 %1145 }
 0x937   :  { %v1150_v55 = vpop.permute.xlu1 %1149 }
 0x938   :  { %v1160_v62 = vsel %vm182_vm1, %v1150_v55, 0 }
 0x94d   :  { %v1152_v56 = vpop.permute.xlu0 %1151  ;;  %v984_v58 = vpop.permute.xlu1 %983 }
 0x94e   :  { %v1163_v59 = vsel %vm182_vm1, %v1152_v56, 0  ;;  %v995_v29 = vsel %vm182_vm1, %v984_v58, 0 }
 0x94f   :  { %1171 = vmatpush.bf16.xpose.msrb.mxu2 %v1163_v59  ;;  %1003 = vmatpush.bf16.xpose.msra.mxu3 %v995_v29 }
 0x955   :  { %v1148_v60 = vpop.permute.xlu0 %1147 }
 0x957   :  { %1172 = vmatpush.bf16.xpose.msrb.mxu2 %v1160_v62 }
 0x95d   :  { %v982_v23 = vpop.permute.xlu0 %981 }
 0x95e   :  { %v992_v13 = vsel %vm182_vm1, %v982_v23, 0  ;;  %1727 = vmatmul.msk.bf16.vlgmr.msrb.gmra.mxu2 %vm182_vm1, %v1146_v0 }
 0x95f   :  { %1004 = vmatpush.bf16.xpose.msra.mxu3 %v992_v13 }
 0x966   :  { %1723 = vmatmul.msk.bf16.vlgmr.msra.gmra.mxu3 %vm182_vm1, %v2439_v41 }
 0x967   :  { %1352 = vmatpush.bf16.msrb.mxu3 %v1343_v33 }
 0x96e   :  { %1728 = vmatmul.msk.bf16.gmra.mxu2 %vm182_vm1, %v1148_v60 }
 0x976   :  { %1724 = vmatmul.msk.bf16.gmra.mxu3 %vm182_vm1, %v2445_v54 }
 0x9e1   :  { %v1174_v3 = vpop.f32.mrf.mxu2 }
 0x9e2   :  { %v1175_v8 = vadd.f32 %v1892_v6, %v1174_v3 }
 0x9e4   :  { %v1184_v9 = vsel %vm214_vm2, %v1175_v8, -inf }
 0x9e5   :  { %1185 = vmax.xlane.f32.xlu2 %v1184_v9 }
 0x9e9   :  { %v1006_v10 = vpop.f32.mrf.mxu3  ;;  %v1176_v11 = vpop.f32.mrf.mxu2 }
 0x9ea   :  { %v1177_v7 = vadd.f32 %v1893_v12, %v1176_v11  ;;  %v1007_v61 = vadd.f32 %v1892_v6, %v1006_v10 }
 0x9ec   :  { %v1187_v14 = vsel %vm214_vm2, %v1177_v7, -inf  ;;  %v1016_v1 = vsel %vm214_vm2, %v1007_v61, -inf }
 0x9ed   :  { %1188 = vmax.xlane.f32.xlu1 %v1187_v14 }
 0x9f1   :  { %v1008_v15 = vpop.f32.mrf.mxu3  ;;  %v1179_v16 = vpop.f32.mrf.mxu2 }
 0x9f2   :  { %v1009_v57 = vadd.f32 %v1893_v12, %v1008_v15  ;;  %v1180_v19 = vadd.f32 %v1894_v18, %v1179_v16 }
 0x9f4   :  { %v1190_v21 = vsel %vm214_vm2, %v1180_v19, -inf  ;;  %v1019_v22 = vsel %vm214_vm2, %v1009_v57, -inf }
 0x9f5   :  { %1191 = vmax.xlane.f32.xlu0 %v1190_v21  ;;  %1017 = vmax.xlane.f32.xlu1 %v1016_v1 }
 0x9f6   :  { %1020 = vmax.xlane.f32.xlu2 %v1019_v22 }
 0x9f9   :  { %v1011_v20 = vpop.f32.mrf.mxu3  ;;  %v1181_v2 = vpop.f32.mrf.mxu2 }
 0x9fa   :  { %v1182_v25 = vadd.f32 %v1895_v24, %v1181_v2  ;;  %v1012_v4 = vadd.f32 %v1894_v18, %v1011_v20 }
 0x9fc   :  { %v1193_v38 = vsel %vm214_vm2, %v1182_v25, -inf  ;;  %v1022_v37 = vsel %vm214_vm2, %v1012_v4, -inf }
 0x9fe   :  { %1194 = vmax.xlane.f32.xlu2 %v1193_v38 }
 0xa01   :  { %v1013_v27 = vpop.f32.mrf.mxu3 }
 0xa02   :  { %v1014_v32 = vadd.f32 %v1895_v24, %v1013_v27 }
 0xa04   :  { %v1025_v35 = vsel %vm214_vm2, %v1014_v32, -inf }
 0xa05   :  { %1026 = vmax.xlane.f32.xlu0 %v1025_v35 }
 0xa06   :  { %1023 = vmax.xlane.f32.xlu2 %v1022_v37 }
 0xa58   :  { %v1186_v39 = vpop.xlane.xlu2 %1185 }
 0xa59   :  { %v1196_v40 = vsub.f32 %v1175_v8, %v1186_v39 }
 0xa5b   :  { %v1200_v42 = vmul.f32 1.442695, %v1196_v40 }
 0xa5d   :  { %1843 = vpow2.f32 %v1200_v42 }
 0xa60   :  { %v1189_v44 = vpop.xlane.xlu1 %1188 }
 0xa61   :  { %v1197_v45 = vsub.f32 %v1177_v7, %v1189_v44 }
 0xa63   :  { %v2474_v47 = vpop.eup %1843  ;;  %v1202_v17 = vmul.f32 1.442695, %v1197_v45 }
 0xa64   :  { %v1208_v43 = vsel %vm214_vm2, %v2474_v47, 0.0 }
 0xa65   :  { %1845 = vpow2.f32 %v1202_v17  ;;  %1209 = vadd.xlane.f32.xlu0 %v1208_v43 }
 0xa68   :  { %v1192_v26 = vpop.xlane.xlu0 %1191  ;;  %v1018_v50 = vpop.xlane.xlu1 %1017 }
 0xa69   :  { %v1198_v49 = vsub.f32 %v1180_v19, %v1192_v26  ;;  %v1028_v51 = vsub.f32 %v1007_v61, %v1018_v50  ;;  %v1021_v52 = vpop.xlane.xlu2 %1020 }
 0xa6a   :  { %v1029_v55 = vsub.f32 %v1009_v57, %v1021_v52 }
 0xa6b   :  { %v2478_v46 = vpop.eup %1845  ;;  %v1204_v48 = vmul.f32 1.442695, %v1198_v49  ;;  %v1032_v53 = vmul.f32 1.442695, %v1028_v51 }
 0xa6c   :  { %v1211_v56 = vsel %vm214_vm2, %v2478_v46, 0.0  ;;  %v1034_v58 = vmul.f32 1.442695, %v1029_v55 }
 0xa6d   :  { %1847 = vpow2.f32 %v1204_v48  ;;  %1212 = vadd.xlane.f32.xlu1 %v1211_v56 }
 0xa6e   :  { %1849 = vpow2.f32 %v1032_v53 }
 0xa6f   :  { %1851 = vpow2.f32 %v1034_v58 }
 0xa71   :  { %v1195_v0 = vpop.xlane.xlu2 %1194 }
 0xa72   :  { %v1199_v10 = vsub.f32 %v1182_v25, %v1195_v0 }
 0xa73   :  { %v2482_v59 = vpop.eup %1847 }
 0xa74   :  { %v2484_v29 = vpop.eup %1849  ;;  %v1214_v60 = vsel %vm214_vm2, %v2482_v59, 0.0  ;;  %v1206_v12 = vmul.f32 1.442695, %v1199_v10 }
 0xa75   :  { %1215 = vadd.xlane.f32.xlu2 %v1214_v60  ;;  %v1040_v62 = vsel %vm214_vm2, %v2484_v29, 0.0  ;;  %v2490_v63 = vpop.eup %1851 }
 0xa76   :  { %1041 = vadd.xlane.f32.xlu0 %v1040_v62  ;;  %v1043_v33 = vsel %vm214_vm2, %v2490_v63, 0.0 }
 0xa78   :  { %v1027_v3 = vpop.xlane.xlu0 %1026 }
 0xa79   :  { %v1024_v23 = vpop.xlane.xlu2 %1023  ;;  %v1031_v8 = vsub.f32 %v1014_v32, %v1027_v3 }
 0xa7a   :  { %v1030_v13 = vsub.f32 %v1012_v4, %v1024_v23 }
 0xa7b   :  { %v1038_v9 = vmul.f32 1.442695, %v1031_v8 }
 0xa7c   :  { %v1036_v6 = vmul.f32 1.442695, %v1030_v13 }
 0xa7e   :  { %1044 = vadd.xlane.f32.xlu0 %v1043_v33  ;;  %1853 = vpow2.f32 %v1036_v6 }
 0xa7f   :  { %1855 = vpow2.f32 %v1038_v9 }
 0xa80   :  { %1857 = vpow2.f32 %v1206_v12 }
 0xa84   :  { %v2500_v11 = vpop.eup %1853 }
 0xa85   :  { %v1046_v7 = vsel %vm214_vm2, %v2500_v11, 0.0  ;;  %v2504_v14 = vpop.eup %1855 }
 0xa86   :  { %1284 = vrot.lane.b32.xlu1 %v2445_v54, %s2061_s21  ;;  %v2508_v61 = vpop.eup %1857 }
 0xa87   :  { %v1217_v15 = vsel %vm214_vm2, %v2508_v61, 0.0 }
 0xa8d   :  { %1282 = vrot.lane.b32.xlu2 %v2439_v41, %s2061_s21 }
 0xa92   :  { %1116 = vrot.lane.b32.xlu0 %v2445_v54, %s2062_s22  ;;  %v1049_v54 = vsel %vm214_vm2, %v2504_v14, 0.0 }
 0xab0   :  { %1047 = vadd.xlane.f32.xlu1 %v1046_v7 }
 0xab6   :  { %1050 = vadd.xlane.f32.xlu2 %v1049_v54 }
 0xabc   :  { %1218 = vadd.xlane.f32.xlu0 %v1217_v15 }
 0xad0   :  { %1114 = vrot.lane.b32.xlu0 %v2439_v41, %s2062_s22 }
 0xad8   :  { %v1210_v16 = vpop.xlane.xlu0 %1209 }
 0xad9   :  { %1859 = vrcp.f32 %v1210_v16  ;;  %v1231_v40 = vand.u32 2147483648, %v1210_v16  ;;  %vm1225_vm4 = vweird.f32 %v1210_v16  ;;  %v1229_v44 = vand.u32 2147483647, %v1210_v16 }
 0xadb   :  { %v1232_v50 = vor.u32 1.1754944e-38, %v1231_v40  ;;  %vm1230_vm7 = vcmp.eq.f32.partialorder %v1229_v44, 8.507059e+37 }
 0xadf   :  { %v1860_v18 = vpop.eup %1859 }
 0xae0   :  { %v1213_v57 = vpop.xlane.xlu1 %1212  ;;  %v1221_v19 = vmul.f32 %v1860_v18, %v1210_v16  ;;  %vm1226_vm14 = vweird.f32 %v1860_v18 }
 0xae1   :  { %1861 = vrcp.f32 %v1213_v57  ;;  %v1246_v27 = vand.u32 2147483648, %v1213_v57  ;;  %vm1240_vm15 = vweird.f32 %v1213_v57  ;;  %v1244_v37 = vand.u32 2147483647, %v1213_v57  ;;  %vm1227_vm5 = vmor %vm1225_vm4, %vm1226_vm14 }
 0xae2   :  { %v1222_v20 = vsub.f32 1.0, %v1221_v19 }
 0xae3   :  { %v1247_v17 = vor.u32 1.1754944e-38, %v1246_v27  ;;  %vm1245_vm6 = vcmp.eq.f32.partialorder %v1244_v37, 8.507059e+37 }
 0xae4   :  { %v1223_v25 = vmul.f32 %v1860_v18, %v1222_v20 }
 0xae6   :  { %v1224_v35 = vadd.f32 %v1860_v18, %v1223_v25 }
 0xae7   :  { %v1862_v21 = vpop.eup %1861 }
 0xae8   :  { %v1236_v1 = vmul.f32 %v1862_v21, %v1213_v57  ;;  %vm1241_vm9 = vweird.f32 %v1862_v21  ;;  %v2514_v39 = vpop.xlane.xlu2 %1215  ;;  %v1228_v26 = vsel %vm1227_vm5, %v1860_v18, %v1224_v35 }
 0xae9   :  { %v1042_v22 = vpop.xlane.xlu0 %1041  ;;  %vm1242_vm3 = vmor %vm1240_vm15, %vm1241_vm9  ;;  %v1233_v48 = vsel %vm1230_vm7, %v1232_v50, %v1228_v26  ;;  %vm1255_vm5 = vweird.f32 %v2514_v39  ;;  %v1259_v27 = vand.u32 2147483647, %v2514_v39 }
 0xaea   :  { %v1237_v2 = vsub.f32 1.0, %v1236_v1  ;;  %1863 = vrcp.f32 %v1042_v22  ;;  %v1063_v58 = vand.u32 2147483648, %v1042_v22  ;;  %vm1057_vm11 = vweird.f32 %v1042_v22 }
 0xaeb   :  { %v1061_v60 = vand.u32 2147483647, %v1042_v22  ;;  %v1234_v33 = vmul.f32 %v2474_v47, %v1233_v48 }
 0xaec   :  { %v1238_v24 = vmul.f32 %v1862_v21, %v1237_v2  ;;  %v1064_v8 = vor.u32 1.1754944e-38, %v1063_v58 }
 0xaed   :  { %vm1062_vm9 = vcmp.eq.f32.partialorder %v1061_v60, 8.507059e+37 }
 0xaee   :  { %v1239_v4 = vadd.f32 %v1862_v21, %v1238_v24 }
 0xaf0   :  { %v1864_v38 = vpop.eup %1863  ;;  %v1243_v45 = vsel %vm1242_vm3, %v1862_v21, %v1239_v4  ;;  %v1283_v23 = vpop.permute.xlu2 %1282 }
 0xaf1   :  { %v1053_v41 = vmul.f32 %v1864_v38, %v1042_v22  ;;  %v1045_v32 = vpop.xlane.xlu0 %1044  ;;  %v1248_v49 = vsel %vm1245_vm6, %v1247_v17, %v1243_v45  ;;  %vm1058_vm8 = vweird.f32 %v1864_v38 }
 0xaf2   :  { %1865 = vrcp.f32 %v1045_v32  ;;  %v1249_v56 = vmul.f32 %v2478_v46, %v1248_v49  ;;  %vm1059_vm12 = vmor %vm1057_vm11, %vm1058_vm8  ;;  %v1078_v0 = vand.u32 2147483648, %v1045_v32  ;;  %v1076_v6 = vand.u32 2147483647, %v1045_v32 }
 0xaf3   :  { %v1054_v42 = vsub.f32 1.0, %v1053_v41  ;;  %vm1072_vm14 = vweird.f32 %v1045_v32  ;;  %1867 = vrcp.f32 %v2514_v39  ;;  %vm1260_vm8 = vcmp.eq.f32.partialorder %v1259_v27, 8.507059e+37 }
 0xaf4   :  { %v1280_v9 = vpack.c.bf16 %v1249_v56, %v1234_v33  ;;  %v1079_v12 = vor.u32 1.1754944e-38, %v1078_v0  ;;  %vm1077_vm3 = vcmp.eq.f32.partialorder %v1076_v6, 8.507059e+37 }
 0xaf5   :  { %v1055_v43 = vmul.f32 %v1864_v38, %v1054_v42 }
 0xaf7   :  { %v1056_v53 = vadd.f32 %v1864_v38, %v1055_v43 }
 0xaf8   :  { %v1866_v51 = vpop.eup %1865  ;;  %v1285_v52 = vpop.permute.xlu1 %1284 }
 0xaf9   :  { %v1068_v55 = vmul.f32 %v1866_v51, %v1045_v32  ;;  %1300 = vmatpush.bf16.msrb.mxu1 %v1285_v52  ;;  %v1060_v13 = vsel %vm1059_vm12, %v1864_v38, %v1056_v53  ;;  %vm1073_vm13 = vweird.f32 %v1866_v51  ;;  %v1868_v18 = vpop.eup %1867  ;;  %v1261_v38 = vand.u32 2147483648, %v2514_v39 }
 0xafa   :  { %v1065_v46 = vsel %vm1062_vm9, %v1064_v8, %v1060_v13  ;;  %vm1074_vm15 = vmor %vm1072_vm14, %vm1073_vm13  ;;  %v1251_v19 = vmul.f32 %v1868_v18, %v2514_v39  ;;  %vm1256_vm4 = vweird.f32 %v1868_v18  ;;  %v1335_v32 = vperm.slane %v2436_v36, 1 }
 0xafb   :  { %v1069_v62 = vsub.f32 1.0, %v1068_v55  ;;  %v1066_v54 = vmul.f32 %v2484_v29, %v1065_v46  ;;  %vm2530_vm6 = vmor %vm1255_vm5, %vm1256_vm4  ;;  %v1262_v45 = vor.u32 1.1754944e-38, %v1261_v38 }
 0xafc   :  { %v1252_v1 = vsub.f32 1.0, %v1251_v19 }
 0xafd   :  { %v1070_v3 = vmul.f32 %v1866_v51, %v1069_v62  ;;  %1301 = vmatpush.bf16.msrb.mxu1 %v1283_v23 }
 0xafe   :  { %v1253_v2 = vmul.f32 %v1868_v18, %v1252_v1 }
 0xaff   :  { %v1071_v10 = vadd.f32 %v1866_v51, %v1070_v3 }
 0xb00   :  { %1729 = vmatmul.msk.bf16.vlgmr.msrb.gmra.mxu1 %vm214_vm2, %v1280_v9  ;;  %v1254_v24 = vadd.f32 %v1868_v18, %v1253_v2 }
 0xb01   :  { %v1075_v7 = vsel %vm1074_vm15, %v1866_v51, %v1071_v10 }
 0xb02   :  { %v1080_v47 = vsel %vm1077_vm3, %v1079_v12, %v1075_v7  ;;  %v1258_v44 = vsel %vm2530_vm6, %v1868_v18, %v1254_v24 }
 0xb03   :  { %v1081_v15 = vmul.f32 %v2490_v63, %v1080_v47  ;;  %v1263_v50 = vsel %vm1260_vm8, %v1262_v45, %v1258_v44 }
 0xb04   :  { %v1117_v16 = vpop.permute.xlu0 %1116  ;;  %v1264_v48 = vmul.f32 %v2482_v59, %v1263_v50 }
 0xb05   :  { %1132 = vmatpush.bf16.msrb.mxu0 %v1117_v16  ;;  %v1112_v57 = vpack.c.bf16 %v1081_v15, %v1066_v54 }
 0xb23   :  { %v2524_v20 = vpop.xlane.xlu1 %1047 }
 0xb24   :  { %v1093_v59 = vand.u32 2147483648, %v2524_v20  ;;  %vm1087_vm4 = vweird.f32 %v2524_v20 }
 0xb26   :  { %v1094_v8 = vor.u32 1.1754944e-38, %v1093_v59 }
 0xb29   :  { %v1051_v21 = vpop.xlane.xlu2 %1050 }
 0xb2a   :  { %v1108_v33 = vand.u32 2147483648, %v1051_v21  ;;  %vm1102_vm15 = vweird.f32 %v1051_v21  ;;  %v1106_v23 = vand.u32 2147483647, %v1051_v21 }
 0xb2c   :  { %v1109_v3 = vor.u32 1.1754944e-38, %v1108_v33  ;;  %vm1107_vm6 = vcmp.eq.f32.partialorder %v1106_v23, 8.507059e+37 }
 0xb2f   :  { %v1219_v22 = vpop.xlane.xlu0 %1218 }
 0xb30   :  { %1869 = vrcp.f32 %v1219_v22  ;;  %v1276_v37 = vand.u32 2147483648, %v1219_v22  ;;  %v1274_v42 = vand.u32 2147483647, %v1219_v22  ;;  %vm1270_vm11 = vweird.f32 %v1219_v22 }
 0xb31   :  { %1871 = vrcp.f32 %v1051_v21 }
 0xb32   :  { %1873 = vrcp.f32 %v2524_v20  ;;  %v1277_v26 = vor.u32 1.1754944e-38, %v1276_v37  ;;  %vm1275_vm13 = vcmp.eq.f32.partialorder %v1274_v42, 8.507059e+37 }
 0xb36   :  { %v1870_v29 = vpop.eup %1869 }
 0xb37   :  { %v1872_v63 = vpop.eup %1871  ;;  %v1266_v25 = vmul.f32 %v1870_v29, %v1219_v22  ;;  %vm1271_vm7 = vweird.f32 %v1870_v29 }
 0xb38   :  { %v1874_v4 = vpop.eup %1873  ;;  %v1098_v35 = vmul.f32 %v1872_v63, %v1051_v21  ;;  %vm1272_vm12 = vmor %vm1270_vm11, %vm1271_vm7  ;;  %vm1103_vm9 = vweird.f32 %v1872_v63 }
 0xb39   :  { %v1267_v41 = vsub.f32 1.0, %v1266_v25  ;;  %v1083_v17 = vmul.f32 %v1874_v4, %v2524_v20  ;;  %vm1088_vm14 = vweird.f32 %v1874_v4  ;;  %vm1104_vm3 = vmor %vm1102_vm15, %vm1103_vm9 }
 0xb3a   :  { %v1099_v39 = vsub.f32 1.0, %v1098_v35  ;;  %vm1089_vm5 = vmor %vm1087_vm4, %vm1088_vm14 }
 0xb3b   :  { %v1268_v40 = vmul.f32 %v1870_v29, %v1267_v41  ;;  %v1084_v51 = vsub.f32 1.0, %v1083_v17 }
 0xb3c   :  { %v1100_v55 = vmul.f32 %v1872_v63, %v1099_v39 }
 0xb3d   :  { %v1269_v43 = vadd.f32 %v1870_v29, %v1268_v40  ;;  %v1085_v60 = vmul.f32 %v1874_v4, %v1084_v51 }
 0xb3e   :  { %v1101_v62 = vadd.f32 %v1872_v63, %v1100_v55 }
 0xb3f   :  { %v1273_v49 = vsel %vm1272_vm12, %v1870_v29, %v1269_v43  ;;  %v1086_v0 = vadd.f32 %v1874_v4, %v1085_v60 }
 0xb40   :  { %v1278_v52 = vsel %vm1275_vm13, %v1277_v26, %v1273_v49  ;;  %v1105_v13 = vsel %vm1104_vm3, %v1872_v63, %v1101_v62 }
 0xb41   :  { %v1279_v53 = vmul.f32 %v2508_v61, %v1278_v52  ;;  %v1091_v61 = vand.u32 2147483647, %v2524_v20  ;;  %v1090_v6 = vsel %vm1089_vm5, %v1874_v4, %v1086_v0  ;;  %v1110_v9 = vsel %vm1107_vm6, %v1109_v3, %v1105_v13 }
 0xb42   :  { %v1115_v56 = vpop.permute.xlu0 %1114  ;;  %v1111_v46 = vmul.f32 %v2504_v14, %v1110_v9 }
 0xb43   :  { %1133 = vmatpush.bf16.msrb.mxu0 %v1115_v56  ;;  %v1281_v58 = vpack.c.bf16 %v1279_v53, %v1264_v48  ;;  %vm1092_vm7 = vcmp.eq.f32.partialorder %v1091_v61, 8.507059e+37 }
 0xb44   :  { %v1095_v10 = vsel %vm1092_vm7, %v1094_v8, %v1090_v6 }
 0xb45   :  { %1730 = vmatmul.msk.bf16.gmra.mxu1 %vm214_vm2, %v1281_v58  ;;  %v1096_v12 = vmul.f32 %v2500_v11, %v1095_v10 }
 0xb46   :  { %1725 = vmatmul.msk.bf16.vlgmr.msrb.gmra.mxu0 %vm214_vm2, %v1112_v57 }
 0xb47   :  { %v1113_v7 = vpack.c.bf16 %v1111_v46, %v1096_v12 }
 0xb56   :  { %1726 = vmatmul.msk.bf16.gmra.mxu0 %vm214_vm2, %v1113_v7 }
 0xb7d   :  { %v1303_v47 = vpop.f32.mrf.mxu1 }
 0xb85   :  { %v1305_v54 = vpop.f32.mrf.mxu1 }
 0xb86   :  { %v1783_v15 = vpack.i.bf16 %v1305_v54, %v1303_v47  ;;  %v1754_v47 = vld [vmem:[#allocation5 + $0x8] sm:$0xff] }
 0xb87   :  { %1488 = vmatpush.bf16.msra.mxu0 %v1754_v47 }
 0xb88   :  { %1784 = vrot.lane.b32.xlu0 %v1783_v15, %s2051_s11 }
 0xbc2   :  { %v1308_v16 = vpop.f32.mrf.mxu1 }
 0xbc3   :  { %v1135_v19 = vpop.f32.mrf.mxu0 }
 0xbca   :  { %v1310_v57 = vpop.f32.mrf.mxu1 }
 0xbcb   :  { %v1788_v18 = vpack.i.bf16 %v1310_v57, %v1308_v16  ;;  %v1137_v14 = vpop.f32.mrf.mxu0 }
 0xbcd   :  { %1789 = vrot.lane.b32.xlu0 %v1788_v18, %s2051_s11 }
 0xbd3   :  { %v1140_v29 = vpop.f32.mrf.mxu0 }
 0xbdb   :  { %v1142_v38 = vpop.f32.mrf.mxu0 }
 0xbfa   :  { %v1785_v21 = vpop.permute.xlu0 %1784 }
 0xbfb   :  { %v1787_v1 = vunpack.i.h.bf16 %v1785_v21  ;;  %v1786_v22 = vunpack.i.l.bf16 %v1785_v21 }
 0xbfd   :  { %v1330_v11 = vsel %vm182_vm1, %v1137_v14, %v1787_v1  ;;  %v1329_v20 = vsel %vm182_vm1, %v1135_v19, %v1786_v22 }
 0xbfe   :  { %v1333_v2 = vpack.c.bf16 %v1330_v11, %v1329_v20 }
 0xc00   :  { %1731 = vmatmul.msk.bf16.vlgmr.msrb.gmra.mxu3 %vm535_vm10, %v1333_v2 }
 0xc3f   :  { %v1790_v63 = vpop.permute.xlu0 %1789 }
 0xc40   :  { %v1792_v24 = vunpack.i.h.bf16 %v1790_v63  ;;  %v1791_v25 = vunpack.i.l.bf16 %v1790_v63 }
 0xc42   :  { %v1331_v4 = vsel %vm182_vm1, %v1140_v29, %v1791_v25  ;;  %v1332_v27 = vsel %vm182_vm1, %v1142_v38, %v1792_v24  ;;  %v1456_v24 = vperm.slane %v2436_v36, 2 }
 0xc43   :  { %v1334_v41 = vpack.c.bf16 %v1332_v27, %v1331_v4  ;;  %v1461_v27 = vperm.slane %v2436_v36, 3 }
 0xc45   :  { %1732 = vmatmul.msk.bf16.gmra.mxu3 %vm535_vm10, %v1334_v41 }
 0xc83   :  { %v1354_v35 = vpop.f32.mrf.mxu3 }
 0xc84   :  { %v1355_v37 = vadd.f32 %v1354_v35, %v1335_v32 }
 0xc86   :  { %v1364_v40 = vadd.f32 %v1355_v37, %v2422_v31 }
 0xc88   :  { %v1368_v42 = vsel %vm138_vm0, %v1364_v40, 0.0 }
 0xc89   :  { %1369 = vadd.xlane.f32.xlu1 %v1368_v42 }
 0xc8b   :  { %v1356_v44 = vpop.f32.mrf.mxu3 }
 0xc8c   :  { %v1357_v45 = vadd.f32 %v1356_v44, %v1335_v32 }
 0xc8e   :  { %v1365_v17 = vadd.f32 %v1357_v45, %v2424_v30 }
 0xc90   :  { %v1371_v43 = vsel %vm138_vm0, %v1365_v17, 0.0 }
 0xc91   :  { %1372 = vadd.xlane.f32.xlu0 %v1371_v43 }
 0xcc8   :  { %v1359_v39 = vpop.f32.mrf.mxu3 }
 0xcc9   :  { %v1360_v26 = vadd.f32 %v1359_v39, %v1335_v32 }
 0xccb   :  { %v1366_v50 = vadd.f32 %v1360_v26, %v2429_v5 }
 0xccd   :  { %v1374_v49 = vsel %vm138_vm0, %v1366_v50, 0.0 }
 0xcce   :  { %1375 = vadd.xlane.f32.xlu2 %v1374_v49 }
 0xcd0   :  { %v1361_v51 = vpop.f32.mrf.mxu3 }
 0xcd1   :  { %v1362_v52 = vadd.f32 %v1361_v51, %v1335_v32 }
 0xcd3   :  { %v1367_v31 = vadd.f32 %v1362_v52, %v2431_v34 }
 0xcd5   :  { %v1377_v48 = vsel %vm138_vm0, %v1367_v31, 0.0 }
 0xcd6   :  { %1378 = vadd.xlane.f32.xlu1 %v1377_v48 }
 0xcfc   :  { %v1370_v53 = vpop.xlane.xlu1 %1369 }
 0xcfd   :  { %v1380_v30 = vmul.f32 %v1370_v53, %v2347_v28 }
 0xcff   :  { %v1384_v55 = vsub.f32 %v1364_v40, %v1380_v30 }
 0xd01   :  { %v1388_v56 = vmul.f32 %v1384_v55, %v1384_v55 }
 0xd03   :  { %v1392_v58 = vsel %vm138_vm0, %v1388_v56, 0.0 }
 0xd04   :  { %v1373_v60 = vpop.xlane.xlu0 %1372  ;;  %1393 = vadd.xlane.f32.xlu2 %v1392_v58 }
 0xd05   :  { %v1381_v5 = vmul.f32 %v1373_v60, %v2347_v28 }
 0xd07   :  { %v1385_v62 = vsub.f32 %v1365_v17, %v1381_v5 }
 0xd09   :  { %v1389_v33 = vmul.f32 %v1385_v62, %v1385_v62 }
 0xd0b   :  { %v1395_v0 = vsel %vm138_vm0, %v1389_v33, 0.0 }
 0xd0c   :  { %1396 = vadd.xlane.f32.xlu1 %v1395_v0 }
 0xd41   :  { %v1376_v34 = vpop.xlane.xlu2 %1375 }
 0xd42   :  { %v1382_v23 = vmul.f32 %v1376_v34, %v2347_v28 }
 0xd44   :  { %v2569_v59 = vsub.f32 %v1366_v50, %v1382_v23 }
 0xd46   :  { %v1390_v61 = vmul.f32 %v2569_v59, %v2569_v59 }
 0xd48   :  { %v1398_v13 = vsel %vm138_vm0, %v1390_v61, 0.0 }
 0xd49   :  { %v1379_v3 = vpop.xlane.xlu1 %1378  ;;  %1399 = vadd.xlane.f32.xlu2 %v1398_v13 }
 0xd4a   :  { %v1383_v6 = vmul.f32 %v1379_v3, %v2347_v28 }
 0xd4c   :  { %v2575_v8 = vsub.f32 %v1367_v31, %v1383_v6  ;;  %v1756_v6 = vld [vmem:[%s2648_s4 + $0x18] sm:$0xff] }
 0xd4d   :  { %1531 = vmatpush.bf16.msra.mxu2 %v1756_v6 }
 0xd4e   :  { %v1391_v9 = vmul.f32 %v2575_v8, %v2575_v8 }
 0xd50   :  { %v1401_v10 = vsel %vm138_vm0, %v1391_v9, 0.0 }
 0xd51   :  { %1402 = vadd.xlane.f32.xlu1 %v1401_v10 }
 0xd77   :  { %v1394_v46 = vpop.xlane.xlu2 %1393 }
 0xd78   :  { %v1404_v12 = vmul.f32 %v1394_v46, %v2347_v28 }
 0xd7a   :  { %v1408_v7 = vadd.f32 1e-05, %v1404_v12 }
 0xd7c   :  { %1875 = vrsqrt.f32 %v1408_v7  ;;  %vm1418_vm10 = vweird.f32 %v1408_v7 }
 0xd7f   :  { %v1397_v54 = vpop.xlane.xlu1 %1396 }
 0xd80   :  { %v1405_v15 = vmul.f32 %v1397_v54, %v2347_v28 }
 0xd82   :  { %v1876_v16 = vpop.eup %1875  ;;  %v1409_v57 = vadd.f32 1e-05, %v1405_v15 }
 0xd83   :  { %v1413_v18 = vmul.f32 %v1876_v16, %v1408_v7  ;;  %vm1419_vm1 = vweird.f32 %v1876_v16 }
 0xd84   :  { %1877 = vrsqrt.f32 %v1409_v57  ;;  %vm1420_vm8 = vmor %vm1418_vm10, %vm1419_vm1  ;;  %vm1428_vm12 = vweird.f32 %v1409_v57 }
 0xd85   :  { %v1414_v19 = vmul.f32 %v1876_v16, %v1413_v18 }
 0xd87   :  { %v1415_v21 = vmul.f32 0.5, %v1414_v19 }
 0xd89   :  { %v1416_v1 = vsub.f32 1.5, %v1415_v21 }
 0xd8a   :  { %v1878_v22 = vpop.eup %1877 }
 0xd8b   :  { %v1417_v14 = vmul.f32 %v1876_v16, %v1416_v1  ;;  %v1423_v11 = vmul.f32 %v1878_v22, %v1409_v57  ;;  %vm1429_vm11 = vweird.f32 %v1878_v22 }
 0xd8c   :  { %vm1430_vm13 = vmor %vm1428_vm12, %vm1429_vm11 }
 0xd8d   :  { %v1424_v20 = vmul.f32 %v1878_v22, %v1423_v11  ;;  %v1421_v2 = vsel %vm1420_vm8, %v1876_v16, %v1417_v14 }
 0xd8e   :  { %v1452_v25 = vmul.f32 %v1421_v2, %v1384_v55 }
 0xd8f   :  { %v1425_v29 = vmul.f32 0.5, %v1424_v20 }
 0xd90   :  { %v1457_v41 = vmul.f32 %v1456_v24, %v1452_v25 }
 0xd91   :  { %v1426_v63 = vsub.f32 1.5, %v1425_v29 }
 0xd92   :  { %v2584_v37 = vadd.f32 %v1461_v27, %v1457_v41 }
 0xd93   :  { %v1427_v38 = vmul.f32 %v1878_v22, %v1426_v63 }
 0xd95   :  { %v1431_v4 = vsel %vm1430_vm13, %v1878_v22, %v1427_v38  ;;  %v1506_v22 = vperm.slane %v2436_v36, 5 }
 0xd96   :  { %v1453_v32 = vmul.f32 %v1431_v4, %v1385_v62 }
 0xd98   :  { %v1458_v35 = vmul.f32 %v1456_v24, %v1453_v32 }
 0xd9a   :  { %v2586_v40 = vadd.f32 %v1461_v27, %v1458_v35 }
 0xd9c   :  { %v1466_v42 = vpack.c.bf16 %v2586_v40, %v2584_v37 }
 0xd9e   :  { %1737 = vmatmul.msk.bf16.vlgmr.msra.gmra.mxu0 %vm138_vm0, %v1466_v42 }
 0xdbc   :  { %v1400_v44 = vpop.xlane.xlu2 %1399 }
 0xdbd   :  { %v1406_v45 = vmul.f32 %v1400_v44, %v2347_v28 }
 0xdbf   :  { %v1410_v17 = vadd.f32 1e-05, %v1406_v45 }
 0xdc1   :  { %1879 = vrsqrt.f32 %v1410_v17  ;;  %vm1438_vm14 = vweird.f32 %v1410_v17 }
 0xdc4   :  { %v1403_v43 = vpop.xlane.xlu1 %1402 }
 0xdc5   :  { %v1407_v39 = vmul.f32 %v1403_v43, %v2347_v28 }
 0xdc7   :  { %v1880_v26 = vpop.eup %1879  ;;  %v1411_v50 = vadd.f32 1e-05, %v1407_v39 }
 0xdc8   :  { %v1433_v49 = vmul.f32 %v1880_v26, %v1410_v17  ;;  %vm1439_vm9 = vweird.f32 %v1880_v26 }
 0xdc9   :  { %1881 = vrsqrt.f32 %v1411_v50  ;;  %vm1440_vm15 = vmor %vm1438_vm14, %vm1439_vm9  ;;  %vm1448_vm4 = vweird.f32 %v1411_v50 }
 0xdca   :  { %v1434_v51 = vmul.f32 %v1880_v26, %v1433_v49 }
 0xdcc   :  { %v1435_v52 = vmul.f32 0.5, %v1434_v51 }
 0xdce   :  { %v1436_v31 = vsub.f32 1.5, %v1435_v52 }
 0xdcf   :  { %v1882_v48 = vpop.eup %1881 }
 0xdd0   :  { %v1437_v53 = vmul.f32 %v1880_v26, %v1436_v31  ;;  %v1443_v30 = vmul.f32 %v1882_v48, %v1411_v50  ;;  %vm1449_vm3 = vweird.f32 %v1882_v48 }
 0xdd1   :  { %vm1450_vm5 = vmor %vm1448_vm4, %vm1449_vm3 }
 0xdd2   :  { %v1444_v55 = vmul.f32 %v1882_v48, %v1443_v30  ;;  %v1441_v56 = vsel %vm1440_vm15, %v1880_v26, %v1437_v53 }
 0xdd3   :  { %v1454_v5 = vmul.f32 %v1441_v56, %v2569_v59  ;;  %v1755_v59 = vld [vmem:[%s2648_s4 + $0x10] sm:$0xff]  ;;  %s2064_s4 = smov [#allocation11]  }
 0xdd4   :  { %v1445_v58 = vmul.f32 0.5, %v1444_v55  ;;  %1532 = vmatpush.bf16.msra.mxu2 %v1755_v59  ;;  %s1654_s29 = sshll.u32 %s2064_s4, 4  ;;  %s1655_s29 = int_to_ptr.vmem [resolvable:$true] %s1654_s29 }
 0xdd5   :  { %v1459_v34 = vmul.f32 %v1456_v24, %v1454_v5 }
 0xdd6   :  { %v1446_v60 = vsub.f32 1.5, %v1445_v58 }
 0xdd7   :  { %v1464_v61 = vadd.f32 %v1461_v27, %v1459_v34 }
 0xdd8   :  { %v1447_v62 = vmul.f32 %v1882_v48, %v1446_v60 }
 0xdda   :  { %v1451_v33 = vsel %vm1450_vm5, %v1882_v48, %v1447_v62 }
 0xddb   :  { %v1455_v0 = vmul.f32 %v1451_v33, %v2575_v8  ;;  %v1468_v8 = vperm.slane %v2436_v36, 4 }
 0xddd   :  { %v1460_v23 = vmul.f32 %v1456_v24, %v1455_v0 }
 0xddf   :  { %v1465_v13 = vadd.f32 %v1461_v27, %v1460_v23 }
 0xde1   :  { %v1467_v3 = vpack.c.bf16 %v1465_v13, %v1464_v61 }
 0xde3   :  { %1738 = vmatmul.msk.bf16.gmra.mxu0 %vm138_vm0, %v1467_v3 }
 0xe1b   :  { %v1490_v9 = vpop.f32.mrf.mxu0 }
 0xe1c   :  { %v1491_v10 = vadd.f32 %v1490_v9, %v1468_v8 }
 0xe1e   :  { %v1500_v7 = vmax.f32 %v1491_v10, 0.0 }
 0xe23   :  { %v1492_v46 = vpop.f32.mrf.mxu0 }
 0xe24   :  { %v1493_v12 = vadd.f32 %v1492_v46, %v1468_v8  ;;  %v1896_v46 = vld [vmem:[#allocation7 + $0x8] sm:$0xff] }
 0xe26   :  { %v1501_v47 = vmax.f32 %v1493_v12, 0.0  ;;  %v1636_v12 = vperm.slane %v1896_v46, 6 }
 0xe28   :  { %v1504_v54 = vpack.c.bf16 %v1501_v47, %v1500_v7 }
 0xe2a   :  { %1747 = vmatmul.msk.bf16.vlgmr.msra.gmra.mxu2 %vm214_vm2, %v1504_v54  ;;  %v1641_v54 = vperm.slane %v1896_v46, 7 }
 0xe60   :  { %v1495_v15 = vpop.f32.mrf.mxu0 }
 0xe61   :  { %v1496_v16 = vadd.f32 %v1495_v15, %v1468_v8 }
 0xe63   :  { %v1502_v19 = vmax.f32 %v1496_v16, 0.0 }
 0xe68   :  { %v1497_v57 = vpop.f32.mrf.mxu0 }
 0xe69   :  { %v1498_v18 = vadd.f32 %v1497_v57, %v1468_v8 }
 0xe6b   :  { %v1503_v21 = vmax.f32 %v1498_v18, 0.0 }
 0xe6d   :  { %v1505_v1 = vpack.c.bf16 %v1503_v21, %v1502_v19 }
 0xe6f   :  { %1748 = vmatmul.msk.bf16.gmra.mxu2 %vm214_vm2, %v1505_v1 }
 0xead   :  { %v1534_v14 = vpop.f32.mrf.mxu2 }
 0xeae   :  { %v1535_v11 = vadd.f32 %v1534_v14, %v1506_v22 }
 0xeb0   :  { %v1544_v20 = vadd.f32 %v1535_v11, %v2584_v37 }
 0xeb2   :  { %v1548_v2 = vsel %vm138_vm0, %v1544_v20, 0.0 }
 0xeb3   :  { %1549 = vadd.xlane.f32.xlu2 %v1548_v2 }
 0xeb5   :  { %v1536_v29 = vpop.f32.mrf.mxu2 }
 0xeb6   :  { %v1537_v63 = vadd.f32 %v1536_v29, %v1506_v22 }
 0xeb8   :  { %v1545_v24 = vadd.f32 %v1537_v63, %v2586_v40 }
 0xeba   :  { %v1551_v25 = vsel %vm138_vm0, %v1545_v24, 0.0 }
 0xebb   :  { %1552 = vadd.xlane.f32.xlu1 %v1551_v25 }
 0xef2   :  { %v1539_v38 = vpop.f32.mrf.mxu2 }
 0xef3   :  { %v1540_v4 = vadd.f32 %v1539_v38, %v1506_v22 }
 0xef5   :  { %v1546_v27 = vadd.f32 %v1540_v4, %v1464_v61 }
 0xef7   :  { %v1554_v41 = vsel %vm138_vm0, %v1546_v27, 0.0 }
 0xef8   :  { %1555 = vadd.xlane.f32.xlu2 %v1554_v41 }
 0xefa   :  { %v1541_v36 = vpop.f32.mrf.mxu2 }
 0xefb   :  { %v1542_v32 = vadd.f32 %v1541_v36, %v1506_v22 }
 0xefd   :  { %v1547_v35 = vadd.f32 %v1542_v32, %v1465_v13 }
 0xeff   :  { %v1557_v37 = vsel %vm138_vm0, %v1547_v35, 0.0 }
 0xf00   :  { %1558 = vadd.xlane.f32.xlu1 %v1557_v37 }
 0xf26   :  { %v1550_v42 = vpop.xlane.xlu2 %1549 }
 0xf27   :  { %v1560_v44 = vmul.f32 %v1550_v42, %v2347_v28 }
 0xf29   :  { %v1564_v45 = vsub.f32 %v1544_v20, %v1560_v44 }
 0xf2b   :  { %v1568_v40 = vmul.f32 %v1564_v45, %v1564_v45 }
 0xf2d   :  { %v1572_v17 = vsel %vm138_vm0, %v1568_v40, 0.0 }
 0xf2e   :  { %v1553_v43 = vpop.xlane.xlu1 %1552  ;;  %1573 = vadd.xlane.f32.xlu0 %v1572_v17 }
 0xf2f   :  { %v1561_v39 = vmul.f32 %v1553_v43, %v2347_v28 }
 0xf31   :  { %v1565_v26 = vsub.f32 %v1545_v24, %v1561_v39 }
 0xf33   :  { %v1569_v50 = vmul.f32 %v1565_v26, %v1565_v26 }
 0xf35   :  { %v1575_v49 = vsel %vm138_vm0, %v1569_v50, 0.0 }
 0xf36   :  { %1576 = vadd.xlane.f32.xlu2 %v1575_v49 }
 0xf6b   :  { %v1556_v51 = vpop.xlane.xlu2 %1555 }
 0xf6c   :  { %v1562_v52 = vmul.f32 %v1556_v51, %v2347_v28 }
 0xf6e   :  { %v2617_v31 = vsub.f32 %v1546_v27, %v1562_v52 }
 0xf70   :  { %v1570_v48 = vmul.f32 %v2617_v31, %v2617_v31 }
 0xf72   :  { %v1578_v53 = vsel %vm138_vm0, %v1570_v48, 0.0 }
 0xf73   :  { %v1559_v30 = vpop.xlane.xlu1 %1558  ;;  %1579 = vadd.xlane.f32.xlu1 %v1578_v53 }
 0xf74   :  { %v1563_v55 = vmul.f32 %v1559_v30, %v2347_v28 }
 0xf76   :  { %v2623_v56 = vsub.f32 %v1547_v35, %v1563_v55 }
 0xf78   :  { %v1571_v58 = vmul.f32 %v2623_v56, %v2623_v56 }
 0xf7a   :  { %v1581_v60 = vsel %vm138_vm0, %v1571_v58, 0.0 }
 0xf7b   :  { %1582 = vadd.xlane.f32.xlu0 %v1581_v60 }
 0xfa1   :  { %v1574_v5 = vpop.xlane.xlu0 %1573 }
 0xfa2   :  { %v1584_v62 = vmul.f32 %v1574_v5, %v2347_v28 }
 0xfa4   :  { %v1588_v33 = vadd.f32 1e-05, %v1584_v62 }
 0xfa6   :  { %1883 = vrsqrt.f32 %v1588_v33  ;;  %vm1598_vm6 = vweird.f32 %v1588_v33 }
 0xfa9   :  { %v1577_v0 = vpop.xlane.xlu2 %1576 }
 0xfaa   :  { %v1585_v34 = vmul.f32 %v1577_v0, %v2347_v28 }
 0xfac   :  { %v1884_v23 = vpop.eup %1883  ;;  %v1589_v61 = vadd.f32 1e-05, %v1585_v34 }
 0xfad   :  { %v1593_v13 = vmul.f32 %v1884_v23, %v1588_v33  ;;  %vm1599_vm2 = vweird.f32 %v1884_v23 }
 0xfae   :  { %1885 = vrsqrt.f32 %v1589_v61  ;;  %vm1600_vm7 = vmor %vm1598_vm6, %vm1599_vm2  ;;  %vm1608_vm10 = vweird.f32 %v1589_v61 }
 0xfaf   :  { %v1594_v3 = vmul.f32 %v1884_v23, %v1593_v13 }
 0xfb1   :  { %v1595_v6 = vmul.f32 0.5, %v1594_v3 }
 0xfb3   :  { %v1596_v59 = vsub.f32 1.5, %v1595_v6 }
 0xfb4   :  { %v1886_v9 = vpop.eup %1885 }
 0xfb5   :  { %v1597_v8 = vmul.f32 %v1884_v23, %v1596_v59  ;;  %v1603_v10 = vmul.f32 %v1886_v9, %v1589_v61  ;;  %vm1609_vm1 = vweird.f32 %v1886_v9 }
 0xfb6   :  { %vm1610_vm8 = vmor %vm1608_vm10, %vm1609_vm1 }
 0xfb7   :  { %v1601_v7 = vsel %vm1600_vm7, %v1884_v23, %v1597_v8  ;;  %v1604_v47 = vmul.f32 %v1886_v9, %v1603_v10 }
 0xfb8   :  { %v1632_v15 = vmul.f32 %v1601_v7, %v1564_v45 }
 0xfb9   :  { %v1605_v16 = vmul.f32 0.5, %v1604_v47 }
 0xfba   :  { %v1637_v57 = vmul.f32 %v1636_v12, %v1632_v15 }
 0xfbb   :  { %v1606_v18 = vsub.f32 1.5, %v1605_v16 }
 0xfbc   :  { %v1642_v19 = vadd.f32 %v1641_v54, %v1637_v57 }
 0xfbd   :  { %v1607_v21 = vmul.f32 %v1886_v9, %v1606_v18 }
 0xfbe   :  { %1646 = vst.msk [vmem:[#allocation11] sm:$0xff] %vm138_vm0, %v1642_v19 }
 0xfbf   :  { %v1611_v1 = vsel %vm1610_vm8, %v1886_v9, %v1607_v21 }
 0xfc0   :  { %v1633_v22 = vmul.f32 %v1611_v1, %v1565_v26 }
 0xfc2   :  { %v1638_v14 = vmul.f32 %v1636_v12, %v1633_v22 }
 0xfc4   :  { %v1643_v11 = vadd.f32 %v1641_v54, %v1638_v14 }
 0xfc6   :  { %1647 = vst.msk [vmem:[#allocation11 + $0x8] sm:$0xff] %vm138_vm0, %v1643_v11 }
 0xfe6   :  { %v1580_v20 = vpop.xlane.xlu1 %1579 }
 0xfe7   :  { %v1586_v2 = vmul.f32 %v1580_v20, %v2347_v28 }
 0xfe9   :  { %v1590_v29 = vadd.f32 1e-05, %v1586_v2 }
 0xfeb   :  { %1887 = vrsqrt.f32 %v1590_v29  ;;  %vm1618_vm12 = vweird.f32 %v1590_v29 }
 0xfee   :  { %v1583_v63 = vpop.xlane.xlu0 %1582 }
 0xfef   :  { %v1587_v24 = vmul.f32 %v1583_v63, %v2347_v28 }
 0xff1   :  { %v1888_v25 = vpop.eup %1887  ;;  %v1591_v38 = vadd.f32 1e-05, %v1587_v24 }
 0xff2   :  { %v1613_v4 = vmul.f32 %v1888_v25, %v1590_v29  ;;  %vm1619_vm11 = vweird.f32 %v1888_v25 }
 0xff3   :  { %1889 = vrsqrt.f32 %v1591_v38  ;;  %vm1620_vm13 = vmor %vm1618_vm12, %vm1619_vm11  ;;  %vm1628_vm14 = vweird.f32 %v1591_v38 }
 0xff4   :  { %v1614_v27 = vmul.f32 %v1888_v25, %v1613_v4 }
 0xff6   :  { %v1615_v41 = vmul.f32 0.5, %v1614_v27 }
 0xff8   :  { %v1616_v36 = vsub.f32 1.5, %v1615_v41 }
 0xff9   :  { %v1890_v32 = vpop.eup %1889 }
 0xffa   :  { %v1617_v35 = vmul.f32 %v1888_v25, %v1616_v36  ;;  %v1623_v37 = vmul.f32 %v1890_v32, %v1591_v38  ;;  %vm1629_vm9 = vweird.f32 %v1890_v32 }
 0xffb   :  { %vm1630_vm15 = vmor %vm1628_vm14, %vm1629_vm9 }
 0xffc   :  { %v1621_v42 = vsel %vm1620_vm13, %v1888_v25, %v1617_v35  ;;  %v1624_v44 = vmul.f32 %v1890_v32, %v1623_v37 }
 0xffd   :  { %v1634_v45 = vmul.f32 %v1621_v42, %v2617_v31 }
 0xffe   :  { %v1625_v40 = vmul.f32 0.5, %v1624_v44 }
 0xfff   :  { %v1639_v17 = vmul.f32 %v1636_v12, %v1634_v45 }
0x1000   :  { %v1626_v28 = vsub.f32 1.5, %v1625_v40 }
0x1001   :  { %v1644_v43 = vadd.f32 %v1641_v54, %v1639_v17 }
0x1002   :  { %v1627_v39 = vmul.f32 %v1890_v32, %v1626_v28 }
0x1003   :  { %1648 = vst.msk [vmem:[#allocation11 + $0x10] sm:$0xff] %vm138_vm0, %v1644_v43 }
0x1004   :  { %v1631_v26 = vsel %vm1630_vm15, %v1890_v32, %v1627_v39 }
0x1005   :  { %v1635_v50 = vmul.f32 %v1631_v26, %v2623_v56 }
0x1007   :  { %v1640_v49 = vmul.f32 %v1636_v12, %v1635_v50 }
0x1009   :  { %v1645_v51 = vadd.f32 %v1641_v54, %v1640_v49 }
0x100b   :  { %1649 = vst.msk [vmem:[#allocation11 + $0x18] sm:$0xff] %vm138_vm0, %v1645_v51 }
0x100c   :  { %1662 = dma.vmem_to_hbm [thread:$0]  %s1655_s29, 512, %s1657_s30, [#allocation4], %s2053_s3, %s2053_s3, %s2054_s20  }
0x100d   :  { %2047 = dma.done.wait [#allocation4], 512  }
0x100e   :  { %2048 = vsyncadd [#allocation4], 4294966784 }
0x100f   :  { %1667 = vsyncpa [#allocation3], 1 }
0x1010   :  { %1668 = vsyncpa [#allocation6], 1 }
0x1011   :  { %1669 = vsyncpa [#allocation9], 1 }
0x1012   :  { %1670 = vsyncpa [#allocation4], 1 }

</bundles_post_ra>
